<compile_context>
chip_gen: v7x
topology: tpu7x:2x2x1
jax: 0.10.0
libtpu: 0.0.40
codegen_flags: <defaults>
</compile_context>

<pallas_src>
import functools

import jax
import jax.numpy as jnp
from jax.experimental import pallas as pl
from jax.experimental.pallas import tpu as pltpu


# ----------------------------- in-kernel helpers -----------------------------
def _layernorm(x, gamma, beta, eps=1e-5):
    mu = jnp.mean(x, axis=-1, keepdims=True)
    xc = x - mu
    var = jnp.mean(xc * xc, axis=-1, keepdims=True)
    return xc * jax.lax.rsqrt(var + eps) * gamma + beta


def _mish(x):
    # x * tanh(softplus(x)); the naive softplus degrades gracefully at both tails.
    return x * jnp.tanh(jnp.log(1.0 + jnp.exp(x)))


def _multihead_attention(q, k, v, num_heads):
    """q: (T, D), k/v: (S, D) -> (T, D). Static per-head loop with lane slices."""
    _, d_model = q.shape
    dh = d_model // num_heads
    scale = 1.0 / (dh ** 0.5)
    outs = []
    for h in range(num_heads):
        lo, hi = h * dh, (h + 1) * dh
        qh = q[:, lo:hi] * scale
        kh = k[:, lo:hi]
        vh = v[:, lo:hi]
        # scores = qh @ kh^T  (contract last dims; MXU handles the transposition)
        s = jax.lax.dot_general(qh, kh, (((1,), (1,)), ((), ())),
                                preferred_element_type=jnp.float32)      # (T, S)
        s = s - jnp.max(s, axis=-1, keepdims=True)
        p = jnp.exp(s)
        p = p / jnp.sum(p, axis=-1, keepdims=True)
        outs.append(jnp.dot(p, vh, preferred_element_type=jnp.float32))  # (T, dh)
    return jnp.concatenate(outs, axis=-1)


# --------------------------------- kernel ------------------------------------
def _film_decoder_kernel(
        x_ref, mem_ref, t_ref,
        ln1_g, ln1_b, ln2_g, ln2_b, ln3_g, ln3_b,
        wqkv, bqkv, wo, bo,
        wq_c, bq_c, wkv_c, bkv_c, wo_c, bo_c,
        w1, b1, w2, b2,
        film_w, film_b,
        out_ref, *, num_heads, d_model):
    D = d_model
    x = x_ref[...]          # (T, D)   tgt[b]
    mem = mem_ref[...]      # (S, D)   memory[b]
    t = t_ref[...]          # (1, D)   diffusion-step embedding t[b]

    # FiLM generators for all three sub-blocks: one fused lane-dense matmul.
    film = jnp.dot(_mish(t), film_w[...],
                   preferred_element_type=jnp.float32) + film_b[...]     # (1, 6D)
    sc1, sh1 = film[:, 0:D], film[:, D:2 * D]
    sc2, sh2 = film[:, 2 * D:3 * D], film[:, 3 * D:4 * D]
    sc3, sh3 = film[:, 4 * D:5 * D], film[:, 5 * D:6 * D]

    # ---- block 1: self-attention (pre-norm) + FiLM-modulated residual ------
    # TODO(synk): tgt_mask / key_padding_mask and rotary embeddings are not
    # implemented (they are None / disabled in this configuration).
    xn = _layernorm(x, ln1_g[...], ln1_b[...])
    qkv = jnp.dot(xn, wqkv[...], preferred_element_type=jnp.float32) + bqkv[...]
    att = _multihead_attention(qkv[:, 0:D], qkv[:, D:2 * D], qkv[:, 2 * D:3 * D],
                               num_heads)
    sa = jnp.dot(att, wo[...], preferred_element_type=jnp.float32) + bo[...]
    x = x + (sc1 + 1.0) * sa + sh1                 # dropout1 == identity (eval)

    # ---- block 2: cross-attention (pre-norm query, raw memory K/V) ---------
    xn = _layernorm(x, ln2_g[...], ln2_b[...])
    q2 = jnp.dot(xn, wq_c[...], preferred_element_type=jnp.float32) + bq_c[...]
    kv = jnp.dot(mem, wkv_c[...], preferred_element_type=jnp.float32) + bkv_c[...]
    att2 = _multihead_attention(q2, kv[:, 0:D], kv[:, D:2 * D], num_heads)
    ca = jnp.dot(att2, wo_c[...], preferred_element_type=jnp.float32) + bo_c[...]
    x = x + (sc2 + 1.0) * ca + sh2                 # dropout2 == identity (eval)

    # ---- block 3: feed-forward (pre-norm, relu) ----------------------------
    xn = _layernorm(x, ln3_g[...], ln3_b[...])
    hdn = jnp.maximum(
        jnp.dot(xn, w1[...], preferred_element_type=jnp.float32) + b1[...], 0.0)
    ff = jnp.dot(hdn, w2[...], preferred_element_type=jnp.float32) + b2[...]
    x = x + (sc3 + 1.0) * ff + sh3                 # dropout3 == identity (eval)

    out_ref[...] = x.astype(out_ref.dtype)


# --------------------------------- wrapper -----------------------------------
_WEIGHT_ORDER = ("ln1_g", "ln1_b", "ln2_g", "ln2_b", "ln3_g", "ln3_b",
                 "wqkv", "bqkv", "wo", "bo",
                 "wq_c", "bq_c", "wkv_c", "bkv_c", "wo_c", "bo_c",
                 "w1", "b1", "w2", "b2",
                 "film_w", "film_b")


def film_decoder_forward(tgt, memory, t, params, *, num_heads):
    """tgt: (B, T, D), memory: (B, S, D), t: (B, D) -> (B, T, D)."""
    B, T, D = tgt.shape
    S = memory.shape[1]
    t3 = t.reshape(B, 1, D).astype(jnp.float32)
    weights = [params[k].astype(jnp.float32) for k in _WEIGHT_ORDER]

    def _resident(shape):                       # full block, constant index_map
        nd = len(shape)
        return pl.BlockSpec(shape, lambda b: (0,) * nd)

    in_specs = [
        pl.BlockSpec((None, T, D), lambda b: (b, 0, 0)),   # tgt[b]
        pl.BlockSpec((None, S, D), lambda b: (b, 0, 0)),   # memory[b]
        pl.BlockSpec((None, 1, D), lambda b: (b, 0, 0)),   # t[b]
    ] + [_resident(w.shape) for w in weights]

    kernel = functools.partial(_film_decoder_kernel,
                               num_heads=num_heads, d_model=D)
    return pl.pallas_call(
        kernel,
        out_shape=jax.ShapeDtypeStruct((B, T, D), jnp.float32),
        grid=(B,),
        in_specs=in_specs,
        out_specs=pl.BlockSpec((None, T, D), lambda b: (b, 0, 0)),
        compiler_params=pltpu.CompilerParams(
            dimension_semantics=("parallel",)),
    )(tgt.astype(jnp.float32), memory.astype(jnp.float32), t3, *weights)


# --------------------------- params & pure-JAX ref ---------------------------
def init_params(key, d_model, ff_dim):
    D, F = d_model, ff_dim
    ks = iter(jax.random.split(key, 32))
    w = lambda shape, s=0.1: s * jax.random.normal(next(ks), shape, jnp.float32)
    p = {}
    for i in (1, 2, 3):
        p[f"ln{i}_g"] = 1.0 + 0.05 * jax.random.normal(next(ks), (1, D), jnp.float32)
        p[f"ln{i}_b"] = 0.05 * jax.random.normal(next(ks), (1, D), jnp.float32)
    p["wqkv"], p["bqkv"] = w((D, 3 * D)), w((1, 3 * D))
    p["wo"], p["bo"] = w((D, D)), w((1, D))
    p["wq_c"], p["bq_c"] = w((D, D)), w((1, D))
    p["wkv_c"], p["bkv_c"] = w((D, 2 * D)), w((1, 2 * D))
    p["wo_c"], p["bo_c"] = w((D, D)), w((1, D))
    p["w1"], p["b1"] = w((D, F)), w((1, F))
    p["w2"], p["b2"] = w((F, D)), w((1, D))
    p["film_w"], p["film_b"] = w((D, 6 * D)), w((1, 6 * D))
    return p


def reference_forward(tgt, memory, t, p, *, num_heads):
    D = tgt.shape[-1]
    H = num_heads

    def ln(x, g, b, eps=1e-5):
        mu = jnp.mean(x, -1, keepdims=True)
        xc = x - mu
        var = jnp.mean(xc * xc, -1, keepdims=True)
        return xc * jax.lax.rsqrt(var + eps) * g + b

    def mish(x):
        return x * jnp.tanh(jnp.log(1.0 + jnp.exp(x)))

    def mha(q, k, v):
        B, T, _ = q.shape
        S = k.shape[1]
        dh = D // H
        qh = q.reshape(B, T, H, dh).transpose(0, 2, 1, 3)
        kh = k.reshape(B, S, H, dh).transpose(0, 2, 1, 3)
        vh = v.reshape(B, S, H, dh).transpose(0, 2, 1, 3)
        s = jnp.einsum("bhtd,bhsd->bhts", qh, kh) / jnp.sqrt(jnp.float32(dh))
        a = jax.nn.softmax(s, axis=-1)
        o = jnp.einsum("bhts,bhsd->bhtd", a, vh)
        return o.transpose(0, 2, 1, 3).reshape(B, T, D)

    film = mish(t) @ p["film_w"] + p["film_b"]                 # (B, 6D)
    sc1, sh1 = film[:, 0:D], film[:, D:2 * D]
    sc2, sh2 = film[:, 2 * D:3 * D], film[:, 3 * D:4 * D]
    sc3, sh3 = film[:, 4 * D:5 * D], film[:, 5 * D:6 * D]

    x = tgt
    xn = ln(x, p["ln1_g"], p["ln1_b"])
    qkv = xn @ p["wqkv"] + p["bqkv"]
    sa = mha(qkv[..., 0:D], qkv[..., D:2 * D], qkv[..., 2 * D:]) @ p["wo"] + p["bo"]
    x = x + (sc1[:, None, :] + 1.0) * sa + sh1[:, None, :]

    xn = ln(x, p["ln2_g"], p["ln2_b"])
    q = xn @ p["wq_c"] + p["bq_c"]
    kv = memory @ p["wkv_c"] + p["bkv_c"]
    ca = mha(q, kv[..., 0:D], kv[..., D:]) @ p["wo_c"] + p["bo_c"]
    x = x + (sc2[:, None, :] + 1.0) * ca + sh2[:, None, :]

    xn = ln(x, p["ln3_g"], p["ln3_b"])
    ff = jnp.maximum(xn @ p["w1"] + p["b1"], 0.0) @ p["w2"] + p["b2"]
    x = x + (sc3[:, None, :] + 1.0) * ff + sh3[:, None, :]
    return x


if __name__ == "__main__":
    B, T, S, D, H, FF = 2, 8, 8, 32, 4, 64
    key = jax.random.PRNGKey(0)
    k1, k2, k3, kp = jax.random.split(key, 4)

    tgt = jax.random.normal(k1, (B, T, D), jnp.float32)
    memory = jax.random.normal(k2, (B, S, D), jnp.float32)
    t = jax.random.normal(k3, (B, D), jnp.float32)
    params = init_params(kp, D, FF)

    out = film_decoder_forward(tgt, memory, t, params, num_heads=H)
    out = jax.block_until_ready(out)

    ref = reference_forward(tgt, memory, t, params, num_heads=H)
    assert out.shape == (B, T, D)
    assert jnp.allclose(out, ref, atol=2e-2, rtol=2e-2), \
        float(jnp.max(jnp.abs(out - ref)))
    print("KERNEL_OK")
</pallas_src>

<mosaic_0001>
module attributes {stable_mosaic.version = 11 : i64} {
  func.func @_film_decoder_kernel(%arg0: i32, %arg1: memref<1x8x32xf32, #tpu.memory_space<vmem>>, %arg2: memref<1x8x32xf32, #tpu.memory_space<vmem>>, %arg3: memref<1x1x32xf32, #tpu.memory_space<vmem>>, %arg4: memref<1x32xf32, #tpu.memory_space<vmem>>, %arg5: memref<1x32xf32, #tpu.memory_space<vmem>>, %arg6: memref<1x32xf32, #tpu.memory_space<vmem>>, %arg7: memref<1x32xf32, #tpu.memory_space<vmem>>, %arg8: memref<1x32xf32, #tpu.memory_space<vmem>>, %arg9: memref<1x32xf32, #tpu.memory_space<vmem>>, %arg10: memref<32x96xf32, #tpu.memory_space<vmem>>, %arg11: memref<1x96xf32, #tpu.memory_space<vmem>>, %arg12: memref<32x32xf32, #tpu.memory_space<vmem>>, %arg13: memref<1x32xf32, #tpu.memory_space<vmem>>, %arg14: memref<32x32xf32, #tpu.memory_space<vmem>>, %arg15: memref<1x32xf32, #tpu.memory_space<vmem>>, %arg16: memref<32x64xf32, #tpu.memory_space<vmem>>, %arg17: memref<1x64xf32, #tpu.memory_space<vmem>>, %arg18: memref<32x32xf32, #tpu.memory_space<vmem>>, %arg19: memref<1x32xf32, #tpu.memory_space<vmem>>, %arg20: memref<32x64xf32, #tpu.memory_space<vmem>>, %arg21: memref<1x64xf32, #tpu.memory_space<vmem>>, %arg22: memref<64x32xf32, #tpu.memory_space<vmem>>, %arg23: memref<1x32xf32, #tpu.memory_space<vmem>>, %arg24: memref<32x192xf32, #tpu.memory_space<vmem>>, %arg25: memref<1x192xf32, #tpu.memory_space<vmem>>, %arg26: memref<1x8x32xf32, #tpu.memory_space<vmem>>) attributes {dimension_semantics = [#tpu.dimension_semantics<parallel>], iteration_bounds = array<i64: 2>, scalar_prefetch = 0 : i64, scratch_operands = 0 : i64, tpu.core_type = #tpu.core_type<tc>, window_params = [{transform_indices = @transform_0, window_bounds = array<i64: 1, 8, 32>}, {transform_indices = @transform_1, window_bounds = array<i64: 1, 8, 32>}, {transform_indices = @transform_2, window_bounds = array<i64: 1, 1, 32>}, {pipeline_mode = #tpu.pipeline_mode<synchronous>, transform_indices = @transform_3, window_bounds = array<i64: 1, 32>}, {pipeline_mode = #tpu.pipeline_mode<synchronous>, transform_indices = @transform_4, window_bounds = array<i64: 1, 32>}, {pipeline_mode = #tpu.pipeline_mode<synchronous>, transform_indices = @transform_5, window_bounds = array<i64: 1, 32>}, {pipeline_mode = #tpu.pipeline_mode<synchronous>, transform_indices = @transform_6, window_bounds = array<i64: 1, 32>}, {pipeline_mode = #tpu.pipeline_mode<synchronous>, transform_indices = @transform_7, window_bounds = array<i64: 1, 32>}, {pipeline_mode = #tpu.pipeline_mode<synchronous>, transform_indices = @transform_8, window_bounds = array<i64: 1, 32>}, {pipeline_mode = #tpu.pipeline_mode<synchronous>, transform_indices = @transform_9, window_bounds = array<i64: 32, 96>}, {pipeline_mode = #tpu.pipeline_mode<synchronous>, transform_indices = @transform_10, window_bounds = array<i64: 1, 96>}, {pipeline_mode = #tpu.pipeline_mode<synchronous>, transform_indices = @transform_11, window_bounds = array<i64: 32, 32>}, {pipeline_mode = #tpu.pipeline_mode<synchronous>, transform_indices = @transform_12, window_bounds = array<i64: 1, 32>}, {pipeline_mode = #tpu.pipeline_mode<synchronous>, transform_indices = @transform_13, window_bounds = array<i64: 32, 32>}, {pipeline_mode = #tpu.pipeline_mode<synchronous>, transform_indices = @transform_14, window_bounds = array<i64: 1, 32>}, {pipeline_mode = #tpu.pipeline_mode<synchronous>, transform_indices = @transform_15, window_bounds = array<i64: 32, 64>}, {pipeline_mode = #tpu.pipeline_mode<synchronous>, transform_indices = @transform_16, window_bounds = array<i64: 1, 64>}, {pipeline_mode = #tpu.pipeline_mode<synchronous>, transform_indices = @transform_17, window_bounds = array<i64: 32, 32>}, {pipeline_mode = #tpu.pipeline_mode<synchronous>, transform_indices = @transform_18, window_bounds = array<i64: 1, 32>}, {pipeline_mode = #tpu.pipeline_mode<synchronous>, transform_indices = @transform_19, window_bounds = array<i64: 32, 64>}, {pipeline_mode = #tpu.pipeline_mode<synchronous>, transform_indices = @transform_20, window_bounds = array<i64: 1, 64>}, {pipeline_mode = #tpu.pipeline_mode<synchronous>, transform_indices = @transform_21, window_bounds = array<i64: 64, 32>}, {pipeline_mode = #tpu.pipeline_mode<synchronous>, transform_indices = @transform_22, window_bounds = array<i64: 1, 32>}, {pipeline_mode = #tpu.pipeline_mode<synchronous>, transform_indices = @transform_23, window_bounds = array<i64: 32, 192>}, {pipeline_mode = #tpu.pipeline_mode<synchronous>, transform_indices = @transform_24, window_bounds = array<i64: 1, 192>}, {transform_indices = @transform_25, window_bounds = array<i64: 1, 8, 32>}]} {
    %c0 = arith.constant 0 : index
    %c0_0 = arith.constant 0 : index
    %c0_1 = arith.constant 0 : index
    %0 = vector.load %arg1[%c0, %c0_0, %c0_1] : memref<1x8x32xf32, #tpu.memory_space<vmem>>, vector<1x8x32xf32>
    %1 = vector.shape_cast %0 : vector<1x8x32xf32> to vector<8x32xf32>
    %c0_2 = arith.constant 0 : index
    %c0_3 = arith.constant 0 : index
    %c0_4 = arith.constant 0 : index
    %2 = vector.load %arg2[%c0_2, %c0_3, %c0_4] : memref<1x8x32xf32, #tpu.memory_space<vmem>>, vector<1x8x32xf32>
    %3 = vector.shape_cast %2 : vector<1x8x32xf32> to vector<8x32xf32>
    %c0_5 = arith.constant 0 : index
    %c0_6 = arith.constant 0 : index
    %c0_7 = arith.constant 0 : index
    %4 = vector.load %arg3[%c0_5, %c0_6, %c0_7] : memref<1x1x32xf32, #tpu.memory_space<vmem>>, vector<1x1x32xf32>
    %5 = vector.shape_cast %4 : vector<1x1x32xf32> to vector<1x32xf32>
    %6 = math.exp %5 : vector<1x32xf32>
    %cst = arith.constant 1.000000e+00 : f32
    %7 = vector.broadcast %cst : f32 to vector<1x32xf32>
    %8 = arith.addf %7, %6 : vector<1x32xf32>
    %9 = math.log %8 : vector<1x32xf32>
    %10 = math.tanh %9 : vector<1x32xf32>
    %11 = arith.mulf %5, %10 : vector<1x32xf32>
    %c0_8 = arith.constant 0 : index
    %c0_9 = arith.constant 0 : index
    %12 = vector.load %arg24[%c0_8, %c0_9] : memref<32x192xf32, #tpu.memory_space<vmem>>, vector<32x192xf32>
    %cst_10 = arith.constant dense<0.000000e+00> : vector<1x192xf32>
    %13 = tpu.matmul %11, %12, %cst_10 {dimension_numbers = #tpu.dot_dimension_numbers<[1], [0], [0], [1], [0, 0, 1, 1], [], []>} : vector<1x32xf32>, vector<32x192xf32>, vector<1x192xf32> -> vector<1x192xf32>
    %c0_11 = arith.constant 0 : index
    %c0_12 = arith.constant 0 : index
    %14 = vector.load %arg25[%c0_11, %c0_12] : memref<1x192xf32, #tpu.memory_space<vmem>>, vector<1x192xf32>
    %15 = arith.addf %13, %14 : vector<1x192xf32>
    %16 = vector.extract_strided_slice %15 {offsets = [0, 0], sizes = [1, 32], strides = [1, 1]} : vector<1x192xf32> to vector<1x32xf32>
    %17 = vector.extract_strided_slice %15 {offsets = [0, 32], sizes = [1, 32], strides = [1, 1]} : vector<1x192xf32> to vector<1x32xf32>
    %18 = vector.extract_strided_slice %15 {offsets = [0, 64], sizes = [1, 32], strides = [1, 1]} : vector<1x192xf32> to vector<1x32xf32>
    %19 = vector.extract_strided_slice %15 {offsets = [0, 96], sizes = [1, 32], strides = [1, 1]} : vector<1x192xf32> to vector<1x32xf32>
    %20 = vector.extract_strided_slice %15 {offsets = [0, 128], sizes = [1, 32], strides = [1, 1]} : vector<1x192xf32> to vector<1x32xf32>
    %21 = vector.extract_strided_slice %15 {offsets = [0, 160], sizes = [1, 32], strides = [1, 1]} : vector<1x192xf32> to vector<1x32xf32>
    %c0_13 = arith.constant 0 : index
    %c0_14 = arith.constant 0 : index
    %22 = vector.load %arg4[%c0_13, %c0_14] : memref<1x32xf32, #tpu.memory_space<vmem>>, vector<1x32xf32>
    %c0_15 = arith.constant 0 : index
    %c0_16 = arith.constant 0 : index
    %23 = vector.load %arg5[%c0_15, %c0_16] : memref<1x32xf32, #tpu.memory_space<vmem>>, vector<1x32xf32>
    %cst_17 = arith.constant dense<0.000000e+00> : vector<8xf32>
    %24 = vector.multi_reduction <add>, %1, %cst_17 [1] : vector<8x32xf32> to vector<8xf32>
    %25 = vector.shape_cast %24 : vector<8xf32> to vector<8x1xf32>
    %cst_18 = arith.constant 3.200000e+01 : f32
    %26 = vector.broadcast %cst_18 : f32 to vector<8x1xf32>
    %27 = arith.divf %25, %26 : vector<8x1xf32>
    %28 = vector.broadcast %27 : vector<8x1xf32> to vector<8x32xf32>
    %29 = arith.subf %1, %28 : vector<8x32xf32>
    %30 = arith.mulf %29, %29 : vector<8x32xf32>
    %cst_19 = arith.constant dense<0.000000e+00> : vector<8xf32>
    %31 = vector.multi_reduction <add>, %30, %cst_19 [1] : vector<8x32xf32> to vector<8xf32>
    %32 = vector.shape_cast %31 : vector<8xf32> to vector<8x1xf32>
    %cst_20 = arith.constant 3.200000e+01 : f32
    %33 = vector.broadcast %cst_20 : f32 to vector<8x1xf32>
    %34 = arith.divf %32, %33 : vector<8x1xf32>
    %cst_21 = arith.constant 9.99999974E-6 : f32
    %35 = vector.broadcast %cst_21 : f32 to vector<8x1xf32>
    %36 = arith.addf %34, %35 : vector<8x1xf32>
    %37 = math.rsqrt %36 : vector<8x1xf32>
    %38 = vector.broadcast %37 : vector<8x1xf32> to vector<8x32xf32>
    %39 = arith.mulf %29, %38 : vector<8x32xf32>
    %40 = vector.broadcast %22 : vector<1x32xf32> to vector<8x32xf32>
    %41 = arith.mulf %39, %40 : vector<8x32xf32>
    %42 = vector.broadcast %23 : vector<1x32xf32> to vector<8x32xf32>
    %43 = arith.addf %41, %42 : vector<8x32xf32>
    %c0_22 = arith.constant 0 : index
    %c0_23 = arith.constant 0 : index
    %44 = vector.load %arg10[%c0_22, %c0_23] : memref<32x96xf32, #tpu.memory_space<vmem>>, vector<32x96xf32>
    %cst_24 = arith.constant dense<0.000000e+00> : vector<8x96xf32>
    %45 = tpu.matmul %43, %44, %cst_24 {dimension_numbers = #tpu.dot_dimension_numbers<[1], [0], [0], [1], [0, 0, 1, 1], [], []>} : vector<8x32xf32>, vector<32x96xf32>, vector<8x96xf32> -> vector<8x96xf32>
    %c0_25 = arith.constant 0 : index
    %c0_26 = arith.constant 0 : index
    %46 = vector.load %arg11[%c0_25, %c0_26] : memref<1x96xf32, #tpu.memory_space<vmem>>, vector<1x96xf32>
    %47 = vector.broadcast %46 : vector<1x96xf32> to vector<8x96xf32>
    %48 = arith.addf %45, %47 : vector<8x96xf32>
    %49 = vector.extract_strided_slice %48 {offsets = [0, 0], sizes = [8, 32], strides = [1, 1]} : vector<8x96xf32> to vector<8x32xf32>
    %50 = vector.extract_strided_slice %48 {offsets = [0, 32], sizes = [8, 32], strides = [1, 1]} : vector<8x96xf32> to vector<8x32xf32>
    %51 = vector.extract_strided_slice %48 {offsets = [0, 64], sizes = [8, 32], strides = [1, 1]} : vector<8x96xf32> to vector<8x32xf32>
    %52 = vector.extract_strided_slice %49 {offsets = [0, 0], sizes = [8, 8], strides = [1, 1]} : vector<8x32xf32> to vector<8x8xf32>
    %cst_27 = arith.constant 0.353553385 : f32
    %53 = vector.broadcast %cst_27 : f32 to vector<8x8xf32>
    %54 = arith.mulf %52, %53 : vector<8x8xf32>
    %55 = vector.extract_strided_slice %50 {offsets = [0, 0], sizes = [8, 8], strides = [1, 1]} : vector<8x32xf32> to vector<8x8xf32>
    %56 = vector.extract_strided_slice %51 {offsets = [0, 0], sizes = [8, 8], strides = [1, 1]} : vector<8x32xf32> to vector<8x8xf32>
    %cst_28 = arith.constant dense<0.000000e+00> : vector<8x8xf32>
    %57 = tpu.matmul %54, %55, %cst_28 {dimension_numbers = #tpu.dot_dimension_numbers<[1], [1], [0], [0], [0, 0, 1, 0], [], []>} : vector<8x8xf32>, vector<8x8xf32>, vector<8x8xf32> -> vector<8x8xf32>
    %cst_29 = arith.constant dense<0xFF800000> : vector<8xf32>
    %58 = vector.multi_reduction <maximumf>, %57, %cst_29 [1] : vector<8x8xf32> to vector<8xf32>
    %59 = vector.shape_cast %58 : vector<8xf32> to vector<8x1xf32>
    %60 = vector.broadcast %59 : vector<8x1xf32> to vector<8x8xf32>
    %61 = arith.subf %57, %60 : vector<8x8xf32>
    %62 = math.exp %61 : vector<8x8xf32>
    %cst_30 = arith.constant dense<0.000000e+00> : vector<8xf32>
    %63 = vector.multi_reduction <add>, %62, %cst_30 [1] : vector<8x8xf32> to vector<8xf32>
    %64 = vector.shape_cast %63 : vector<8xf32> to vector<8x1xf32>
    %65 = vector.broadcast %64 : vector<8x1xf32> to vector<8x8xf32>
    %66 = arith.divf %62, %65 : vector<8x8xf32>
    %cst_31 = arith.constant dense<0.000000e+00> : vector<8x8xf32>
    %67 = tpu.matmul %66, %56, %cst_31 {dimension_numbers = #tpu.dot_dimension_numbers<[1], [0], [0], [1], [0, 0, 1, 1], [], []>} : vector<8x8xf32>, vector<8x8xf32>, vector<8x8xf32> -> vector<8x8xf32>
    %68 = vector.extract_strided_slice %49 {offsets = [0, 8], sizes = [8, 8], strides = [1, 1]} : vector<8x32xf32> to vector<8x8xf32>
    %cst_32 = arith.constant 0.353553385 : f32
    %69 = vector.broadcast %cst_32 : f32 to vector<8x8xf32>
    %70 = arith.mulf %68, %69 : vector<8x8xf32>
    %71 = vector.extract_strided_slice %50 {offsets = [0, 8], sizes = [8, 8], strides = [1, 1]} : vector<8x32xf32> to vector<8x8xf32>
    %72 = vector.extract_strided_slice %51 {offsets = [0, 8], sizes = [8, 8], strides = [1, 1]} : vector<8x32xf32> to vector<8x8xf32>
    %cst_33 = arith.constant dense<0.000000e+00> : vector<8x8xf32>
    %73 = tpu.matmul %70, %71, %cst_33 {dimension_numbers = #tpu.dot_dimension_numbers<[1], [1], [0], [0], [0, 0, 1, 0], [], []>} : vector<8x8xf32>, vector<8x8xf32>, vector<8x8xf32> -> vector<8x8xf32>
    %cst_34 = arith.constant dense<0xFF800000> : vector<8xf32>
    %74 = vector.multi_reduction <maximumf>, %73, %cst_34 [1] : vector<8x8xf32> to vector<8xf32>
    %75 = vector.shape_cast %74 : vector<8xf32> to vector<8x1xf32>
    %76 = vector.broadcast %75 : vector<8x1xf32> to vector<8x8xf32>
    %77 = arith.subf %73, %76 : vector<8x8xf32>
    %78 = math.exp %77 : vector<8x8xf32>
    %cst_35 = arith.constant dense<0.000000e+00> : vector<8xf32>
    %79 = vector.multi_reduction <add>, %78, %cst_35 [1] : vector<8x8xf32> to vector<8xf32>
    %80 = vector.shape_cast %79 : vector<8xf32> to vector<8x1xf32>
    %81 = vector.broadcast %80 : vector<8x1xf32> to vector<8x8xf32>
    %82 = arith.divf %78, %81 : vector<8x8xf32>
    %cst_36 = arith.constant dense<0.000000e+00> : vector<8x8xf32>
    %83 = tpu.matmul %82, %72, %cst_36 {dimension_numbers = #tpu.dot_dimension_numbers<[1], [0], [0], [1], [0, 0, 1, 1], [], []>} : vector<8x8xf32>, vector<8x8xf32>, vector<8x8xf32> -> vector<8x8xf32>
    %84 = vector.extract_strided_slice %49 {offsets = [0, 16], sizes = [8, 8], strides = [1, 1]} : vector<8x32xf32> to vector<8x8xf32>
    %cst_37 = arith.constant 0.353553385 : f32
    %85 = vector.broadcast %cst_37 : f32 to vector<8x8xf32>
    %86 = arith.mulf %84, %85 : vector<8x8xf32>
    %87 = vector.extract_strided_slice %50 {offsets = [0, 16], sizes = [8, 8], strides = [1, 1]} : vector<8x32xf32> to vector<8x8xf32>
    %88 = vector.extract_strided_slice %51 {offsets = [0, 16], sizes = [8, 8], strides = [1, 1]} : vector<8x32xf32> to vector<8x8xf32>
    %cst_38 = arith.constant dense<0.000000e+00> : vector<8x8xf32>
    %89 = tpu.matmul %86, %87, %cst_38 {dimension_numbers = #tpu.dot_dimension_numbers<[1], [1], [0], [0], [0, 0, 1, 0], [], []>} : vector<8x8xf32>, vector<8x8xf32>, vector<8x8xf32> -> vector<8x8xf32>
    %cst_39 = arith.constant dense<0xFF800000> : vector<8xf32>
    %90 = vector.multi_reduction <maximumf>, %89, %cst_39 [1] : vector<8x8xf32> to vector<8xf32>
    %91 = vector.shape_cast %90 : vector<8xf32> to vector<8x1xf32>
    %92 = vector.broadcast %91 : vector<8x1xf32> to vector<8x8xf32>
    %93 = arith.subf %89, %92 : vector<8x8xf32>
    %94 = math.exp %93 : vector<8x8xf32>
    %cst_40 = arith.constant dense<0.000000e+00> : vector<8xf32>
    %95 = vector.multi_reduction <add>, %94, %cst_40 [1] : vector<8x8xf32> to vector<8xf32>
    %96 = vector.shape_cast %95 : vector<8xf32> to vector<8x1xf32>
    %97 = vector.broadcast %96 : vector<8x1xf32> to vector<8x8xf32>
    %98 = arith.divf %94, %97 : vector<8x8xf32>
    %cst_41 = arith.constant dense<0.000000e+00> : vector<8x8xf32>
    %99 = tpu.matmul %98, %88, %cst_41 {dimension_numbers = #tpu.dot_dimension_numbers<[1], [0], [0], [1], [0, 0, 1, 1], [], []>} : vector<8x8xf32>, vector<8x8xf32>, vector<8x8xf32> -> vector<8x8xf32>
    %100 = vector.extract_strided_slice %49 {offsets = [0, 24], sizes = [8, 8], strides = [1, 1]} : vector<8x32xf32> to vector<8x8xf32>
    %cst_42 = arith.constant 0.353553385 : f32
    %101 = vector.broadcast %cst_42 : f32 to vector<8x8xf32>
    %102 = arith.mulf %100, %101 : vector<8x8xf32>
    %103 = vector.extract_strided_slice %50 {offsets = [0, 24], sizes = [8, 8], strides = [1, 1]} : vector<8x32xf32> to vector<8x8xf32>
    %104 = vector.extract_strided_slice %51 {offsets = [0, 24], sizes = [8, 8], strides = [1, 1]} : vector<8x32xf32> to vector<8x8xf32>
    %cst_43 = arith.constant dense<0.000000e+00> : vector<8x8xf32>
    %105 = tpu.matmul %102, %103, %cst_43 {dimension_numbers = #tpu.dot_dimension_numbers<[1], [1], [0], [0], [0, 0, 1, 0], [], []>} : vector<8x8xf32>, vector<8x8xf32>, vector<8x8xf32> -> vector<8x8xf32>
    %cst_44 = arith.constant dense<0xFF800000> : vector<8xf32>
    %106 = vector.multi_reduction <maximumf>, %105, %cst_44 [1] : vector<8x8xf32> to vector<8xf32>
    %107 = vector.shape_cast %106 : vector<8xf32> to vector<8x1xf32>
    %108 = vector.broadcast %107 : vector<8x1xf32> to vector<8x8xf32>
    %109 = arith.subf %105, %108 : vector<8x8xf32>
    %110 = math.exp %109 : vector<8x8xf32>
    %cst_45 = arith.constant dense<0.000000e+00> : vector<8xf32>
    %111 = vector.multi_reduction <add>, %110, %cst_45 [1] : vector<8x8xf32> to vector<8xf32>
    %112 = vector.shape_cast %111 : vector<8xf32> to vector<8x1xf32>
    %113 = vector.broadcast %112 : vector<8x1xf32> to vector<8x8xf32>
    %114 = arith.divf %110, %113 : vector<8x8xf32>
    %cst_46 = arith.constant dense<0.000000e+00> : vector<8x8xf32>
    %115 = tpu.matmul %114, %104, %cst_46 {dimension_numbers = #tpu.dot_dimension_numbers<[1], [0], [0], [1], [0, 0, 1, 1], [], []>} : vector<8x8xf32>, vector<8x8xf32>, vector<8x8xf32> -> vector<8x8xf32>
    %116 = tpu.concatenate %67, %83, %99, %115 in 1 : vector<8x8xf32>, vector<8x8xf32>, vector<8x8xf32>, vector<8x8xf32> -> vector<8x32xf32>
    %c0_47 = arith.constant 0 : index
    %c0_48 = arith.constant 0 : index
    %117 = vector.load %arg12[%c0_47, %c0_48] : memref<32x32xf32, #tpu.memory_space<vmem>>, vector<32x32xf32>
    %cst_49 = arith.constant dense<0.000000e+00> : vector<8x32xf32>
    %118 = tpu.matmul %116, %117, %cst_49 {dimension_numbers = #tpu.dot_dimension_numbers<[1], [0], [0], [1], [0, 0, 1, 1], [], []>} : vector<8x32xf32>, vector<32x32xf32>, vector<8x32xf32> -> vector<8x32xf32>
    %c0_50 = arith.constant 0 : index
    %c0_51 = arith.constant 0 : index
    %119 = vector.load %arg13[%c0_50, %c0_51] : memref<1x32xf32, #tpu.memory_space<vmem>>, vector<1x32xf32>
    %120 = vector.broadcast %119 : vector<1x32xf32> to vector<8x32xf32>
    %121 = arith.addf %118, %120 : vector<8x32xf32>
    %cst_52 = arith.constant 1.000000e+00 : f32
    %122 = vector.broadcast %cst_52 : f32 to vector<1x32xf32>
    %123 = arith.addf %16, %122 : vector<1x32xf32>
    %124 = vector.broadcast %123 : vector<1x32xf32> to vector<8x32xf32>
    %125 = arith.mulf %124, %121 : vector<8x32xf32>
    %126 = arith.addf %1, %125 : vector<8x32xf32>
    %127 = vector.broadcast %17 : vector<1x32xf32> to vector<8x32xf32>
    %128 = arith.addf %126, %127 : vector<8x32xf32>
    %c0_53 = arith.constant 0 : index
    %c0_54 = arith.constant 0 : index
    %129 = vector.load %arg6[%c0_53, %c0_54] : memref<1x32xf32, #tpu.memory_space<vmem>>, vector<1x32xf32>
    %c0_55 = arith.constant 0 : index
    %c0_56 = arith.constant 0 : index
    %130 = vector.load %arg7[%c0_55, %c0_56] : memref<1x32xf32, #tpu.memory_space<vmem>>, vector<1x32xf32>
    %cst_57 = arith.constant dense<0.000000e+00> : vector<8xf32>
    %131 = vector.multi_reduction <add>, %128, %cst_57 [1] : vector<8x32xf32> to vector<8xf32>
    %132 = vector.shape_cast %131 : vector<8xf32> to vector<8x1xf32>
    %cst_58 = arith.constant 3.200000e+01 : f32
    %133 = vector.broadcast %cst_58 : f32 to vector<8x1xf32>
    %134 = arith.divf %132, %133 : vector<8x1xf32>
    %135 = vector.broadcast %134 : vector<8x1xf32> to vector<8x32xf32>
    %136 = arith.subf %128, %135 : vector<8x32xf32>
    %137 = arith.mulf %136, %136 : vector<8x32xf32>
    %cst_59 = arith.constant dense<0.000000e+00> : vector<8xf32>
    %138 = vector.multi_reduction <add>, %137, %cst_59 [1] : vector<8x32xf32> to vector<8xf32>
    %139 = vector.shape_cast %138 : vector<8xf32> to vector<8x1xf32>
    %cst_60 = arith.constant 3.200000e+01 : f32
    %140 = vector.broadcast %cst_60 : f32 to vector<8x1xf32>
    %141 = arith.divf %139, %140 : vector<8x1xf32>
    %cst_61 = arith.constant 9.99999974E-6 : f32
    %142 = vector.broadcast %cst_61 : f32 to vector<8x1xf32>
    %143 = arith.addf %141, %142 : vector<8x1xf32>
    %144 = math.rsqrt %143 : vector<8x1xf32>
    %145 = vector.broadcast %144 : vector<8x1xf32> to vector<8x32xf32>
    %146 = arith.mulf %136, %145 : vector<8x32xf32>
    %147 = vector.broadcast %129 : vector<1x32xf32> to vector<8x32xf32>
    %148 = arith.mulf %146, %147 : vector<8x32xf32>
    %149 = vector.broadcast %130 : vector<1x32xf32> to vector<8x32xf32>
    %150 = arith.addf %148, %149 : vector<8x32xf32>
    %c0_62 = arith.constant 0 : index
    %c0_63 = arith.constant 0 : index
    %151 = vector.load %arg14[%c0_62, %c0_63] : memref<32x32xf32, #tpu.memory_space<vmem>>, vector<32x32xf32>
    %cst_64 = arith.constant dense<0.000000e+00> : vector<8x32xf32>
    %152 = tpu.matmul %150, %151, %cst_64 {dimension_numbers = #tpu.dot_dimension_numbers<[1], [0], [0], [1], [0, 0, 1, 1], [], []>} : vector<8x32xf32>, vector<32x32xf32>, vector<8x32xf32> -> vector<8x32xf32>
    %c0_65 = arith.constant 0 : index
    %c0_66 = arith.constant 0 : index
    %153 = vector.load %arg15[%c0_65, %c0_66] : memref<1x32xf32, #tpu.memory_space<vmem>>, vector<1x32xf32>
    %154 = vector.broadcast %153 : vector<1x32xf32> to vector<8x32xf32>
    %155 = arith.addf %152, %154 : vector<8x32xf32>
    %c0_67 = arith.constant 0 : index
    %c0_68 = arith.constant 0 : index
    %156 = vector.load %arg16[%c0_67, %c0_68] : memref<32x64xf32, #tpu.memory_space<vmem>>, vector<32x64xf32>
    %cst_69 = arith.constant dense<0.000000e+00> : vector<8x64xf32>
    %157 = tpu.matmul %3, %156, %cst_69 {dimension_numbers = #tpu.dot_dimension_numbers<[1], [0], [0], [1], [0, 0, 1, 1], [], []>} : vector<8x32xf32>, vector<32x64xf32>, vector<8x64xf32> -> vector<8x64xf32>
    %c0_70 = arith.constant 0 : index
    %c0_71 = arith.constant 0 : index
    %158 = vector.load %arg17[%c0_70, %c0_71] : memref<1x64xf32, #tpu.memory_space<vmem>>, vector<1x64xf32>
    %159 = vector.broadcast %158 : vector<1x64xf32> to vector<8x64xf32>
    %160 = arith.addf %157, %159 : vector<8x64xf32>
    %161 = vector.extract_strided_slice %160 {offsets = [0, 0], sizes = [8, 32], strides = [1, 1]} : vector<8x64xf32> to vector<8x32xf32>
    %162 = vector.extract_strided_slice %160 {offsets = [0, 32], sizes = [8, 32], strides = [1, 1]} : vector<8x64xf32> to vector<8x32xf32>
    %163 = vector.extract_strided_slice %155 {offsets = [0, 0], sizes = [8, 8], strides = [1, 1]} : vector<8x32xf32> to vector<8x8xf32>
    %cst_72 = arith.constant 0.353553385 : f32
    %164 = vector.broadcast %cst_72 : f32 to vector<8x8xf32>
    %165 = arith.mulf %163, %164 : vector<8x8xf32>
    %166 = vector.extract_strided_slice %161 {offsets = [0, 0], sizes = [8, 8], strides = [1, 1]} : vector<8x32xf32> to vector<8x8xf32>
    %167 = vector.extract_strided_slice %162 {offsets = [0, 0], sizes = [8, 8], strides = [1, 1]} : vector<8x32xf32> to vector<8x8xf32>
    %cst_73 = arith.constant dense<0.000000e+00> : vector<8x8xf32>
    %168 = tpu.matmul %165, %166, %cst_73 {dimension_numbers = #tpu.dot_dimension_numbers<[1], [1], [0], [0], [0, 0, 1, 0], [], []>} : vector<8x8xf32>, vector<8x8xf32>, vector<8x8xf32> -> vector<8x8xf32>
    %cst_74 = arith.constant dense<0xFF800000> : vector<8xf32>
    %169 = vector.multi_reduction <maximumf>, %168, %cst_74 [1] : vector<8x8xf32> to vector<8xf32>
    %170 = vector.shape_cast %169 : vector<8xf32> to vector<8x1xf32>
    %171 = vector.broadcast %170 : vector<8x1xf32> to vector<8x8xf32>
    %172 = arith.subf %168, %171 : vector<8x8xf32>
    %173 = math.exp %172 : vector<8x8xf32>
    %cst_75 = arith.constant dense<0.000000e+00> : vector<8xf32>
    %174 = vector.multi_reduction <add>, %173, %cst_75 [1] : vector<8x8xf32> to vector<8xf32>
    %175 = vector.shape_cast %174 : vector<8xf32> to vector<8x1xf32>
    %176 = vector.broadcast %175 : vector<8x1xf32> to vector<8x8xf32>
    %177 = arith.divf %173, %176 : vector<8x8xf32>
    %cst_76 = arith.constant dense<0.000000e+00> : vector<8x8xf32>
    %178 = tpu.matmul %177, %167, %cst_76 {dimension_numbers = #tpu.dot_dimension_numbers<[1], [0], [0], [1], [0, 0, 1, 1], [], []>} : vector<8x8xf32>, vector<8x8xf32>, vector<8x8xf32> -> vector<8x8xf32>
    %179 = vector.extract_strided_slice %155 {offsets = [0, 8], sizes = [8, 8], strides = [1, 1]} : vector<8x32xf32> to vector<8x8xf32>
    %cst_77 = arith.constant 0.353553385 : f32
    %180 = vector.broadcast %cst_77 : f32 to vector<8x8xf32>
    %181 = arith.mulf %179, %180 : vector<8x8xf32>
    %182 = vector.extract_strided_slice %161 {offsets = [0, 8], sizes = [8, 8], strides = [1, 1]} : vector<8x32xf32> to vector<8x8xf32>
    %183 = vector.extract_strided_slice %162 {offsets = [0, 8], sizes = [8, 8], strides = [1, 1]} : vector<8x32xf32> to vector<8x8xf32>
    %cst_78 = arith.constant dense<0.000000e+00> : vector<8x8xf32>
    %184 = tpu.matmul %181, %182, %cst_78 {dimension_numbers = #tpu.dot_dimension_numbers<[1], [1], [0], [0], [0, 0, 1, 0], [], []>} : vector<8x8xf32>, vector<8x8xf32>, vector<8x8xf32> -> vector<8x8xf32>
    %cst_79 = arith.constant dense<0xFF800000> : vector<8xf32>
    %185 = vector.multi_reduction <maximumf>, %184, %cst_79 [1] : vector<8x8xf32> to vector<8xf32>
    %186 = vector.shape_cast %185 : vector<8xf32> to vector<8x1xf32>
    %187 = vector.broadcast %186 : vector<8x1xf32> to vector<8x8xf32>
    %188 = arith.subf %184, %187 : vector<8x8xf32>
    %189 = math.exp %188 : vector<8x8xf32>
    %cst_80 = arith.constant dense<0.000000e+00> : vector<8xf32>
    %190 = vector.multi_reduction <add>, %189, %cst_80 [1] : vector<8x8xf32> to vector<8xf32>
    %191 = vector.shape_cast %190 : vector<8xf32> to vector<8x1xf32>
    %192 = vector.broadcast %191 : vector<8x1xf32> to vector<8x8xf32>
    %193 = arith.divf %189, %192 : vector<8x8xf32>
    %cst_81 = arith.constant dense<0.000000e+00> : vector<8x8xf32>
    %194 = tpu.matmul %193, %183, %cst_81 {dimension_numbers = #tpu.dot_dimension_numbers<[1], [0], [0], [1], [0, 0, 1, 1], [], []>} : vector<8x8xf32>, vector<8x8xf32>, vector<8x8xf32> -> vector<8x8xf32>
    %195 = vector.extract_strided_slice %155 {offsets = [0, 16], sizes = [8, 8], strides = [1, 1]} : vector<8x32xf32> to vector<8x8xf32>
    %cst_82 = arith.constant 0.353553385 : f32
    %196 = vector.broadcast %cst_82 : f32 to vector<8x8xf32>
    %197 = arith.mulf %195, %196 : vector<8x8xf32>
    %198 = vector.extract_strided_slice %161 {offsets = [0, 16], sizes = [8, 8], strides = [1, 1]} : vector<8x32xf32> to vector<8x8xf32>
    %199 = vector.extract_strided_slice %162 {offsets = [0, 16], sizes = [8, 8], strides = [1, 1]} : vector<8x32xf32> to vector<8x8xf32>
    %cst_83 = arith.constant dense<0.000000e+00> : vector<8x8xf32>
    %200 = tpu.matmul %197, %198, %cst_83 {dimension_numbers = #tpu.dot_dimension_numbers<[1], [1], [0], [0], [0, 0, 1, 0], [], []>} : vector<8x8xf32>, vector<8x8xf32>, vector<8x8xf32> -> vector<8x8xf32>
    %cst_84 = arith.constant dense<0xFF800000> : vector<8xf32>
    %201 = vector.multi_reduction <maximumf>, %200, %cst_84 [1] : vector<8x8xf32> to vector<8xf32>
    %202 = vector.shape_cast %201 : vector<8xf32> to vector<8x1xf32>
    %203 = vector.broadcast %202 : vector<8x1xf32> to vector<8x8xf32>
    %204 = arith.subf %200, %203 : vector<8x8xf32>
    %205 = math.exp %204 : vector<8x8xf32>
    %cst_85 = arith.constant dense<0.000000e+00> : vector<8xf32>
    %206 = vector.multi_reduction <add>, %205, %cst_85 [1] : vector<8x8xf32> to vector<8xf32>
    %207 = vector.shape_cast %206 : vector<8xf32> to vector<8x1xf32>
    %208 = vector.broadcast %207 : vector<8x1xf32> to vector<8x8xf32>
    %209 = arith.divf %205, %208 : vector<8x8xf32>
    %cst_86 = arith.constant dense<0.000000e+00> : vector<8x8xf32>
    %210 = tpu.matmul %209, %199, %cst_86 {dimension_numbers = #tpu.dot_dimension_numbers<[1], [0], [0], [1], [0, 0, 1, 1], [], []>} : vector<8x8xf32>, vector<8x8xf32>, vector<8x8xf32> -> vector<8x8xf32>
    %211 = vector.extract_strided_slice %155 {offsets = [0, 24], sizes = [8, 8], strides = [1, 1]} : vector<8x32xf32> to vector<8x8xf32>
    %cst_87 = arith.constant 0.353553385 : f32
    %212 = vector.broadcast %cst_87 : f32 to vector<8x8xf32>
    %213 = arith.mulf %211, %212 : vector<8x8xf32>
    %214 = vector.extract_strided_slice %161 {offsets = [0, 24], sizes = [8, 8], strides = [1, 1]} : vector<8x32xf32> to vector<8x8xf32>
    %215 = vector.extract_strided_slice %162 {offsets = [0, 24], sizes = [8, 8], strides = [1, 1]} : vector<8x32xf32> to vector<8x8xf32>
    %cst_88 = arith.constant dense<0.000000e+00> : vector<8x8xf32>
    %216 = tpu.matmul %213, %214, %cst_88 {dimension_numbers = #tpu.dot_dimension_numbers<[1], [1], [0], [0], [0, 0, 1, 0], [], []>} : vector<8x8xf32>, vector<8x8xf32>, vector<8x8xf32> -> vector<8x8xf32>
    %cst_89 = arith.constant dense<0xFF800000> : vector<8xf32>
    %217 = vector.multi_reduction <maximumf>, %216, %cst_89 [1] : vector<8x8xf32> to vector<8xf32>
    %218 = vector.shape_cast %217 : vector<8xf32> to vector<8x1xf32>
    %219 = vector.broadcast %218 : vector<8x1xf32> to vector<8x8xf32>
    %220 = arith.subf %216, %219 : vector<8x8xf32>
    %221 = math.exp %220 : vector<8x8xf32>
    %cst_90 = arith.constant dense<0.000000e+00> : vector<8xf32>
    %222 = vector.multi_reduction <add>, %221, %cst_90 [1] : vector<8x8xf32> to vector<8xf32>
    %223 = vector.shape_cast %222 : vector<8xf32> to vector<8x1xf32>
    %224 = vector.broadcast %223 : vector<8x1xf32> to vector<8x8xf32>
    %225 = arith.divf %221, %224 : vector<8x8xf32>
    %cst_91 = arith.constant dense<0.000000e+00> : vector<8x8xf32>
    %226 = tpu.matmul %225, %215, %cst_91 {dimension_numbers = #tpu.dot_dimension_numbers<[1], [0], [0], [1], [0, 0, 1, 1], [], []>} : vector<8x8xf32>, vector<8x8xf32>, vector<8x8xf32> -> vector<8x8xf32>
    %227 = tpu.concatenate %178, %194, %210, %226 in 1 : vector<8x8xf32>, vector<8x8xf32>, vector<8x8xf32>, vector<8x8xf32> -> vector<8x32xf32>
    %c0_92 = arith.constant 0 : index
    %c0_93 = arith.constant 0 : index
    %228 = vector.load %arg18[%c0_92, %c0_93] : memref<32x32xf32, #tpu.memory_space<vmem>>, vector<32x32xf32>
    %cst_94 = arith.constant dense<0.000000e+00> : vector<8x32xf32>
    %229 = tpu.matmul %227, %228, %cst_94 {dimension_numbers = #tpu.dot_dimension_numbers<[1], [0], [0], [1], [0, 0, 1, 1], [], []>} : vector<8x32xf32>, vector<32x32xf32>, vector<8x32xf32> -> vector<8x32xf32>
    %c0_95 = arith.constant 0 : index
    %c0_96 = arith.constant 0 : index
    %230 = vector.load %arg19[%c0_95, %c0_96] : memref<1x32xf32, #tpu.memory_space<vmem>>, vector<1x32xf32>
    %231 = vector.broadcast %230 : vector<1x32xf32> to vector<8x32xf32>
    %232 = arith.addf %229, %231 : vector<8x32xf32>
    %cst_97 = arith.constant 1.000000e+00 : f32
    %233 = vector.broadcast %cst_97 : f32 to vector<1x32xf32>
    %234 = arith.addf %18, %233 : vector<1x32xf32>
    %235 = vector.broadcast %234 : vector<1x32xf32> to vector<8x32xf32>
    %236 = arith.mulf %235, %232 : vector<8x32xf32>
    %237 = arith.addf %128, %236 : vector<8x32xf32>
    %238 = vector.broadcast %19 : vector<1x32xf32> to vector<8x32xf32>
    %239 = arith.addf %237, %238 : vector<8x32xf32>
    %c0_98 = arith.constant 0 : index
    %c0_99 = arith.constant 0 : index
    %240 = vector.load %arg8[%c0_98, %c0_99] : memref<1x32xf32, #tpu.memory_space<vmem>>, vector<1x32xf32>
    %c0_100 = arith.constant 0 : index
    %c0_101 = arith.constant 0 : index
    %241 = vector.load %arg9[%c0_100, %c0_101] : memref<1x32xf32, #tpu.memory_space<vmem>>, vector<1x32xf32>
    %cst_102 = arith.constant dense<0.000000e+00> : vector<8xf32>
    %242 = vector.multi_reduction <add>, %239, %cst_102 [1] : vector<8x32xf32> to vector<8xf32>
    %243 = vector.shape_cast %242 : vector<8xf32> to vector<8x1xf32>
    %cst_103 = arith.constant 3.200000e+01 : f32
    %244 = vector.broadcast %cst_103 : f32 to vector<8x1xf32>
    %245 = arith.divf %243, %244 : vector<8x1xf32>
    %246 = vector.broadcast %245 : vector<8x1xf32> to vector<8x32xf32>
    %247 = arith.subf %239, %246 : vector<8x32xf32>
    %248 = arith.mulf %247, %247 : vector<8x32xf32>
    %cst_104 = arith.constant dense<0.000000e+00> : vector<8xf32>
    %249 = vector.multi_reduction <add>, %248, %cst_104 [1] : vector<8x32xf32> to vector<8xf32>
    %250 = vector.shape_cast %249 : vector<8xf32> to vector<8x1xf32>
    %cst_105 = arith.constant 3.200000e+01 : f32
    %251 = vector.broadcast %cst_105 : f32 to vector<8x1xf32>
    %252 = arith.divf %250, %251 : vector<8x1xf32>
    %cst_106 = arith.constant 9.99999974E-6 : f32
    %253 = vector.broadcast %cst_106 : f32 to vector<8x1xf32>
    %254 = arith.addf %252, %253 : vector<8x1xf32>
    %255 = math.rsqrt %254 : vector<8x1xf32>
    %256 = vector.broadcast %255 : vector<8x1xf32> to vector<8x32xf32>
    %257 = arith.mulf %247, %256 : vector<8x32xf32>
    %258 = vector.broadcast %240 : vector<1x32xf32> to vector<8x32xf32>
    %259 = arith.mulf %257, %258 : vector<8x32xf32>
    %260 = vector.broadcast %241 : vector<1x32xf32> to vector<8x32xf32>
    %261 = arith.addf %259, %260 : vector<8x32xf32>
    %c0_107 = arith.constant 0 : index
    %c0_108 = arith.constant 0 : index
    %262 = vector.load %arg20[%c0_107, %c0_108] : memref<32x64xf32, #tpu.memory_space<vmem>>, vector<32x64xf32>
    %cst_109 = arith.constant dense<0.000000e+00> : vector<8x64xf32>
    %263 = tpu.matmul %261, %262, %cst_109 {dimension_numbers = #tpu.dot_dimension_numbers<[1], [0], [0], [1], [0, 0, 1, 1], [], []>} : vector<8x32xf32>, vector<32x64xf32>, vector<8x64xf32> -> vector<8x64xf32>
    %c0_110 = arith.constant 0 : index
    %c0_111 = arith.constant 0 : index
    %264 = vector.load %arg21[%c0_110, %c0_111] : memref<1x64xf32, #tpu.memory_space<vmem>>, vector<1x64xf32>
    %265 = vector.broadcast %264 : vector<1x64xf32> to vector<8x64xf32>
    %266 = arith.addf %263, %265 : vector<8x64xf32>
    %cst_112 = arith.constant 0.000000e+00 : f32
    %267 = vector.broadcast %cst_112 : f32 to vector<8x64xf32>
    %268 = arith.maximumf %266, %267 : vector<8x64xf32>
    %c0_113 = arith.constant 0 : index
    %c0_114 = arith.constant 0 : index
    %269 = vector.load %arg22[%c0_113, %c0_114] : memref<64x32xf32, #tpu.memory_space<vmem>>, vector<64x32xf32>
    %cst_115 = arith.constant dense<0.000000e+00> : vector<8x32xf32>
    %270 = tpu.matmul %268, %269, %cst_115 {dimension_numbers = #tpu.dot_dimension_numbers<[1], [0], [0], [1], [0, 0, 1, 1], [], []>} : vector<8x64xf32>, vector<64x32xf32>, vector<8x32xf32> -> vector<8x32xf32>
    %c0_116 = arith.constant 0 : index
    %c0_117 = arith.constant 0 : index
    %271 = vector.load %arg23[%c0_116, %c0_117] : memref<1x32xf32, #tpu.memory_space<vmem>>, vector<1x32xf32>
    %272 = vector.broadcast %271 : vector<1x32xf32> to vector<8x32xf32>
    %273 = arith.addf %270, %272 : vector<8x32xf32>
    %cst_118 = arith.constant 1.000000e+00 : f32
    %274 = vector.broadcast %cst_118 : f32 to vector<1x32xf32>
    %275 = arith.addf %20, %274 : vector<1x32xf32>
    %276 = vector.broadcast %275 : vector<1x32xf32> to vector<8x32xf32>
    %277 = arith.mulf %276, %273 : vector<8x32xf32>
    %278 = arith.addf %239, %277 : vector<8x32xf32>
    %279 = vector.broadcast %21 : vector<1x32xf32> to vector<8x32xf32>
    %280 = arith.addf %278, %279 : vector<8x32xf32>
    %c0_119 = arith.constant 0 : index
    %c0_120 = arith.constant 0 : index
    %c0_121 = arith.constant 0 : index
    %281 = vector.load %arg26[%c0_119, %c0_120, %c0_121] : memref<1x8x32xf32, #tpu.memory_space<vmem>>, vector<1x8x32xf32>
    %282 = vector.shape_cast %281 : vector<1x8x32xf32> to vector<8x32xf32>
    %283 = vector.shape_cast %280 : vector<8x32xf32> to vector<1x8x32xf32>
    tpu.vector_store %arg26[%c0_119, %c0_120, %c0_121], %283 {strides = array<i32>} : memref<1x8x32xf32, #tpu.memory_space<vmem>>, vector<1x8x32xf32>,
    return
  }
  func.func @transform_0(%arg0: i32) -> (i32, i32, i32) {
    %c0_i32 = arith.constant 0 : i32
    %c0_i32_0 = arith.constant 0 : i32
    %c0_i32_1 = arith.constant 0 : i32
    return %arg0, %c0_i32, %c0_i32_0 : i32, i32, i32
  }
  func.func @transform_1(%arg0: i32) -> (i32, i32, i32) {
    %c0_i32 = arith.constant 0 : i32
    %c0_i32_0 = arith.constant 0 : i32
    %c0_i32_1 = arith.constant 0 : i32
    return %arg0, %c0_i32, %c0_i32_0 : i32, i32, i32
  }
  func.func @transform_2(%arg0: i32) -> (i32, i32, i32) {
    %c0_i32 = arith.constant 0 : i32
    %c0_i32_0 = arith.constant 0 : i32
    %c0_i32_1 = arith.constant 0 : i32
    return %arg0, %c0_i32, %c0_i32_0 : i32, i32, i32
  }
  func.func @transform_3(%arg0: i32) -> (i32, i32) {
    %c0_i32 = arith.constant 0 : i32
    %c0_i32_0 = arith.constant 0 : i32
    %c0_i32_1 = arith.constant 0 : i32
    return %c0_i32, %c0_i32_0 : i32, i32
  }
  func.func @transform_4(%arg0: i32) -> (i32, i32) {
    %c0_i32 = arith.constant 0 : i32
    %c0_i32_0 = arith.constant 0 : i32
    %c0_i32_1 = arith.constant 0 : i32
    return %c0_i32, %c0_i32_0 : i32, i32
  }
  func.func @transform_5(%arg0: i32) -> (i32, i32) {
    %c0_i32 = arith.constant 0 : i32
    %c0_i32_0 = arith.constant 0 : i32
    %c0_i32_1 = arith.constant 0 : i32
    return %c0_i32, %c0_i32_0 : i32, i32
  }
  func.func @transform_6(%arg0: i32) -> (i32, i32) {
    %c0_i32 = arith.constant 0 : i32
    %c0_i32_0 = arith.constant 0 : i32
    %c0_i32_1 = arith.constant 0 : i32
    return %c0_i32, %c0_i32_0 : i32, i32
  }
  func.func @transform_7(%arg0: i32) -> (i32, i32) {
    %c0_i32 = arith.constant 0 : i32
    %c0_i32_0 = arith.constant 0 : i32
    %c0_i32_1 = arith.constant 0 : i32
    return %c0_i32, %c0_i32_0 : i32, i32
  }
  func.func @transform_8(%arg0: i32) -> (i32, i32) {
    %c0_i32 = arith.constant 0 : i32
    %c0_i32_0 = arith.constant 0 : i32
    %c0_i32_1 = arith.constant 0 : i32
    return %c0_i32, %c0_i32_0 : i32, i32
  }
  func.func @transform_9(%arg0: i32) -> (i32, i32) {
    %c0_i32 = arith.constant 0 : i32
    %c0_i32_0 = arith.constant 0 : i32
    %c0_i32_1 = arith.constant 0 : i32
    return %c0_i32, %c0_i32_0 : i32, i32
  }
  func.func @transform_10(%arg0: i32) -> (i32, i32) {
    %c0_i32 = arith.constant 0 : i32
    %c0_i32_0 = arith.constant 0 : i32
    %c0_i32_1 = arith.constant 0 : i32
    return %c0_i32, %c0_i32_0 : i32, i32
  }
  func.func @transform_11(%arg0: i32) -> (i32, i32) {
    %c0_i32 = arith.constant 0 : i32
    %c0_i32_0 = arith.constant 0 : i32
    %c0_i32_1 = arith.constant 0 : i32
    return %c0_i32, %c0_i32_0 : i32, i32
  }
  func.func @transform_12(%arg0: i32) -> (i32, i32) {
    %c0_i32 = arith.constant 0 : i32
    %c0_i32_0 = arith.constant 0 : i32
    %c0_i32_1 = arith.constant 0 : i32
    return %c0_i32, %c0_i32_0 : i32, i32
  }
  func.func @transform_13(%arg0: i32) -> (i32, i32) {
    %c0_i32 = arith.constant 0 : i32
    %c0_i32_0 = arith.constant 0 : i32
    %c0_i32_1 = arith.constant 0 : i32
    return %c0_i32, %c0_i32_0 : i32, i32
  }
  func.func @transform_14(%arg0: i32) -> (i32, i32) {
    %c0_i32 = arith.constant 0 : i32
    %c0_i32_0 = arith.constant 0 : i32
    %c0_i32_1 = arith.constant 0 : i32
    return %c0_i32, %c0_i32_0 : i32, i32
  }
  func.func @transform_15(%arg0: i32) -> (i32, i32) {
    %c0_i32 = arith.constant 0 : i32
    %c0_i32_0 = arith.constant 0 : i32
    %c0_i32_1 = arith.constant 0 : i32
    return %c0_i32, %c0_i32_0 : i32, i32
  }
  func.func @transform_16(%arg0: i32) -> (i32, i32) {
    %c0_i32 = arith.constant 0 : i32
    %c0_i32_0 = arith.constant 0 : i32
    %c0_i32_1 = arith.constant 0 : i32
    return %c0_i32, %c0_i32_0 : i32, i32
  }
  func.func @transform_17(%arg0: i32) -> (i32, i32) {
    %c0_i32 = arith.constant 0 : i32
    %c0_i32_0 = arith.constant 0 : i32
    %c0_i32_1 = arith.constant 0 : i32
    return %c0_i32, %c0_i32_0 : i32, i32
  }
  func.func @transform_18(%arg0: i32) -> (i32, i32) {
    %c0_i32 = arith.constant 0 : i32
    %c0_i32_0 = arith.constant 0 : i32
    %c0_i32_1 = arith.constant 0 : i32
    return %c0_i32, %c0_i32_0 : i32, i32
  }
  func.func @transform_19(%arg0: i32) -> (i32, i32) {
    %c0_i32 = arith.constant 0 : i32
    %c0_i32_0 = arith.constant 0 : i32
    %c0_i32_1 = arith.constant 0 : i32
    return %c0_i32, %c0_i32_0 : i32, i32
  }
  func.func @transform_20(%arg0: i32) -> (i32, i32) {
    %c0_i32 = arith.constant 0 : i32
    %c0_i32_0 = arith.constant 0 : i32
    %c0_i32_1 = arith.constant 0 : i32
    return %c0_i32, %c0_i32_0 : i32, i32
  }
  func.func @transform_21(%arg0: i32) -> (i32, i32) {
    %c0_i32 = arith.constant 0 : i32
    %c0_i32_0 = arith.constant 0 : i32
    %c0_i32_1 = arith.constant 0 : i32
    return %c0_i32, %c0_i32_0 : i32, i32
  }
  func.func @transform_22(%arg0: i32) -> (i32, i32) {
    %c0_i32 = arith.constant 0 : i32
    %c0_i32_0 = arith.constant 0 : i32
    %c0_i32_1 = arith.constant 0 : i32
    return %c0_i32, %c0_i32_0 : i32, i32
  }
  func.func @transform_23(%arg0: i32) -> (i32, i32) {
    %c0_i32 = arith.constant 0 : i32
    %c0_i32_0 = arith.constant 0 : i32
    %c0_i32_1 = arith.constant 0 : i32
    return %c0_i32, %c0_i32_0 : i32, i32
  }
  func.func @transform_24(%arg0: i32) -> (i32, i32) {
    %c0_i32 = arith.constant 0 : i32
    %c0_i32_0 = arith.constant 0 : i32
    %c0_i32_1 = arith.constant 0 : i32
    return %c0_i32, %c0_i32_0 : i32, i32
  }
  func.func @transform_25(%arg0: i32) -> (i32, i32, i32) {
    %c0_i32 = arith.constant 0 : i32
    %c0_i32_0 = arith.constant 0 : i32
    %c0_i32_1 = arith.constant 0 : i32
    return %arg0, %c0_i32, %c0_i32_0 : i32, i32, i32
  }
}

</mosaic_0001>

<bundles_post_ra>
// kernel: tpu_custom_call.1
= control target key start
LH: loop header
LB: loop body
LE: loop exit
PB: predicated region body
PF: predicated region fallthrough
CT: control target
= control target key end

     0   :  { %s5746_s0 = inlined_call_operand.hbm [shape: f32[2,8,32], index: 0, kind: input, shape index: {}]   ;;  %s5747_s1 = inlined_call_operand.hbm [shape: f32[2,8,32], index: 1, kind: input, shape index: {}]   ;;  %s5748_s2 = inlined_call_operand.hbm [shape: f32[2,1,32], index: 2, kind: input, shape index: {}]   ;;  %s5749_s3 = inlined_call_operand.hbm [shape: f32[1,32], index: 3, kind: input, shape index: {}]   ;;  %s5750_s4 = inlined_call_operand.hbm [shape: f32[1,32], index: 4, kind: input, shape index: {}]   ;;  %s5751_s5 = inlined_call_operand.hbm [shape: f32[1,32], index: 5, kind: input, shape index: {}]   ;;  %s5752_s6 = inlined_call_operand.hbm [shape: f32[1,32], index: 6, kind: input, shape index: {}]   ;;  %s5753_s7 = inlined_call_operand.hbm [shape: f32[1,32], index: 7, kind: input, shape index: {}]   ;;  %s5754_s8 = inlined_call_operand.hbm [shape: f32[1,32], index: 8, kind: input, shape index: {}]   ;;  %s5755_s9 = inlined_call_operand.vmem [shape: f32[32,96], index: 9, kind: input, shape index: {}]   ;;  %s5756_s10 = inlined_call_operand.hbm [shape: f32[1,96], index: 10, kind: input, shape index: {}]   ;;  %s5757_s11 = inlined_call_operand.vmem [shape: f32[32,32], index: 11, kind: input, shape index: {}]   ;;  %s5758_s12 = inlined_call_operand.hbm [shape: f32[1,32], index: 12, kind: input, shape index: {}]   ;;  %s5759_s13 = inlined_call_operand.hbm [shape: f32[32,32], index: 13, kind: input, shape index: {}]   ;;  %s5760_s14 = inlined_call_operand.hbm [shape: f32[1,32], index: 14, kind: input, shape index: {}]   ;;  %s5761_s15 = inlined_call_operand.hbm [shape: f32[32,64], index: 15, kind: input, shape index: {}]   ;;  %s5762_s16 = inlined_call_operand.hbm [shape: f32[1,64], index: 16, kind: input, shape index: {}]   ;;  %s5763_s17 = inlined_call_operand.hbm [shape: f32[32,32], index: 17, kind: input, shape index: {}]   ;;  %s5764_s18 = inlined_call_operand.vmem [shape: f32[1,32], index: 18, kind: input, shape index: {}]   ;;  %s5765_s19 = inlined_call_operand.hbm [shape: f32[32,64], index: 19, kind: input, shape index: {}]   ;;  %s5766_s20 = inlined_call_operand.vmem [shape: f32[1,64], index: 20, kind: input, shape index: {}]   ;;  %s5767_s21 = inlined_call_operand.vmem [shape: f32[64,32], index: 21, kind: input, shape index: {}]   ;;  %s5768_s22 = inlined_call_operand.vmem [shape: f32[1,32], index: 22, kind: input, shape index: {}]   ;;  %s5769_s23 = inlined_call_operand.vmem [shape: f32[32,192], index: 23, kind: input, shape index: {}]   ;;  %s5770_s24 = inlined_call_operand.vmem [shape: f32[1,192], index: 24, kind: input, shape index: {}]   ;;  %s5771_s25 = inlined_call_operand.hbm [shape: f32[2,8,32], index: 25, kind: output, shape index: {}]  }
   0x1   :  { %5814 = sst [smem:[#allocation45_spill]] %s5746_s0 }
   0x2   :  { %5815 = sst [smem:[#allocation46_spill]] %s5747_s1 }
   0x3   :  { %5816 = sst [smem:[#allocation47_spill]] %s5748_s2 }
   0x4   :  { %5817 = sst [smem:[#allocation48_spill]] %s5749_s3 }
   0x5   :  { %5818 = sst [smem:[#allocation49_spill]] %s5750_s4 }
   0x6   :  { %5819 = sst [smem:[#allocation50_spill]] %s5751_s5 }
   0x7   :  { %5820 = sst [smem:[#allocation51_spill]] %s5752_s6 }
   0x8   :  { %5821 = sst [smem:[#allocation52_spill]] %s5753_s7 }
   0x9   :  { %5822 = sst [smem:[#allocation53_spill]] %s5754_s8 }
   0xa   :  { %5823 = sst [smem:[#allocation54_spill]] %s5755_s9 }
   0xb   :  { %5824 = sst [smem:[#allocation55_spill]] %s5756_s10 }
   0xc   :  { %5825 = sst [smem:[#allocation56_spill]] %s5757_s11 }
   0xd   :  { %5826 = sst [smem:[#allocation57_spill]] %s5758_s12 }
   0xe   :  { %5827 = sst [smem:[#allocation58_spill]] %s5759_s13 }
   0xf   :  { %5828 = sst [smem:[#allocation59_spill]] %s5760_s14 }
  0x10   :  { %5829 = sst [smem:[#allocation60_spill]] %s5761_s15 }
  0x11   :  { %5830 = sst [smem:[#allocation61_spill]] %s5763_s17 }
  0x12   :  { %5831 = sst [smem:[#allocation62_spill]] %s5764_s18 }
  0x13   :  { %5832 = sst [smem:[#allocation63_spill]] %s5766_s20 }
  0x14   :  { %5833 = sst [smem:[#allocation64_spill]] %s5767_s21 }
  0x15   :  { %5834 = sst [smem:[#allocation65_spill]] %s5768_s22 }
  0x16   :  { %5835 = sst [smem:[#allocation66_spill]] %s5769_s23 }
  0x17   :  { %5836 = sst [smem:[#allocation67_spill]] %s5770_s24 }
  0x18   :  { %5837 = sst [smem:[#allocation68_spill]] %s5771_s25 }
  0x19   :  { %30 = vsyncpa [#allocation3], 0 }
  0x1a   :  { %32 = vsyncpa [#allocation3 + $0x1], 0 }
  0x1b   :  { %33 = vsyncpa [#allocation6], 0 }
  0x1c   :  { %35 = vsyncpa [#allocation6 + $0x1], 0 }
  0x1d   :  { %36 = vsyncpa [#allocation9], 0 }
  0x1e   :  { %37 = vsyncpa [#allocation12], 0 }
  0x1f   :  { %38 = vsyncpa [#allocation15], 0 }
  0x20   :  { %39 = vsyncpa [#allocation18], 0 }
  0x21   :  { %40 = vsyncpa [#allocation21], 0 }
  0x22   :  { %41 = vsyncpa [#allocation24], 0 }
  0x23   :  { %42 = vsyncpa [#allocation27], 0 }
  0x24   :  { %43 = vsyncpa [#allocation4], 0 }
  0x25   :  { %45 = vsyncpa [#allocation4 + $0x1], 0  ;;  %s4867_s29 = smov 0   ;;  %s4869_s2 = smov 0  }
  0x26   :  { %s4871_s6 = smov 0   ;;  %s4873_s30 = smov 0  }
  0x27 LB: > { %5838 = sst [smem:[#allocation40_spill]] %s4685_s29  ;;  %s4699_s7 = smov [#allocation8]   ;;  %s4697_s30 = sphi %s4873_s30, %s5909_s30   ;;  %s4693_s6 = sphi %s4871_s6, %s5911_s6   ;;  %s4689_s2 = sphi %s4869_s2, %s5913_s2   ;;  %s4685_s29 = sphi %s4867_s29, %s5912_s29  }
  0x28   : > { %5839 = sst [smem:[#allocation41_spill]] %s4693_s6  ;;  %s635_s3 = sshll.u32 %s4699_s7, 4  ;;  %s4893_s3 = int_to_ptr.vmem [resolvable:$true] %s635_s3 }
  0x29   : > { %s4888_s26 = sadd.s32 4294967295, %s4697_s30   ;;  %p3476_p0 = scmp.ge.s32.totalorder %s4697_s30, 1 }
  0x2a   : > { %p5787_p1 = scmp.eq.s32.totalorder %s4888_s26, 0  ;;  %p622_p2 = scmp.lt.s32.totalorder %s4697_s30, 3 }
  0x2b   : > { %s4700_s8 = smov [#allocation11]   ;;  %s4701_s4 = smov [#allocation14]  }
  0x2c   : > { %p4895_p3 = pnand %p3476_p0, %p622_p2  ;;  %s657_s27 = sshll.u32 %s4700_s8, 4  ;;  %s4902_s27 = int_to_ptr.vmem [resolvable:$true] %s657_s27 }
  0x2d   : > { %s679_s28 = sshll.u32 %s4701_s4, 4  ;;  %s4702_s5 = smov [#allocation17]   ;;  %s4910_s28 = int_to_ptr.vmem [resolvable:$true] %s679_s28 }
  0x2e   : > { %s5840_s1 = scalar_select %p4895_p3, 1, 0 }
  0x2f   : > { %p3920_p5 = pneg %p4895_p3  ;;  %s4912_s0 = sshll.u32 %s4702_s5, 4  ;;  %s705_s0 = int_to_ptr.vmem [resolvable:$true] %s4912_s0 }
  0x30   : > { %s5842_s22 = sld [smem:[#allocation48_spill]] }
  0x31   : > { %p4906_p6 = pnand %p3920_p5, %p5787_p1 }
  0x33   : > { %s5841_s9 = scalar_select %p4906_p6, 1, 0 }
  0x34   : > { %p4922_p8 = pneg %p4906_p6 }
  0x36   : > { %s4117_s20 = scalar_lea.hbm %s5842_s22, 16 }
  0x37   : > { %p4118_p7 = scmp.ne.s32.totalorder %s5842_s22, %s4117_s20  ;;  %p4124_p11 = scmp.lt.u32.totalorder %s4117_s20, %s5842_s22 }
  0x38   : > { %s5843_s4 = scalar_select %p4922_p8, 1, 0 }
  0x39   : > { %p4120_p9 = pnand %p4922_p8, %p4118_p7 }
  0x3b   : > { %p4121_p10 = pneg %p4120_p9 }
  0x3d   : > { %p4126_p12 = pnand %p4124_p11, %p4121_p10 }
  0x3f   : > { %4129 = shalt.err (!%p4126_p12)
}
  0x40   : > { %s4130_s21 = scalar_lea.vmem %s4893_s3, 16  ;;  %s4137_s25 = scalar_lea.vmem %s4893_s3, 32 }
  0x41   : > { %p4131_p13 = scmp.ne.s32.totalorder %s4893_s3, %s4130_s21  ;;  %p4138_p5 = scmp.lt.s32.totalorder %s4893_s3, %s4893_s3 }
  0x42   : > { %p4139_p7 = scmp.lt.s32.totalorder %s4137_s25, %s4130_s21 }
  0x43   : > { %p4133_p0 = pnand %p4131_p13, %p4922_p8 }
  0x44   : > { %p4140_p9 = por %p4139_p7, %p4138_p5 }
  0x45   : > { %p4134_p2 = pneg %p4133_p0 }
  0x47   : > { %p4141_p4 = pnand %p4140_p9, %p4134_p2 }
  0x49   : > { %4144 = shalt.err (!%p4141_p4)
}
  0x4a   : > { %3923 = dma.hbm_to_vmem [thread:$0]  (!%p4906_p6), %s5842_s22, 16, %s4893_s3, [#allocation9]  }
  0x4b   : > { %s5844_s5 = sld [smem:[#allocation50_spill]] }
  0x51   : > { %s4145_s24 = scalar_lea.hbm %s5844_s5, 16 }
  0x52   : > { %p4146_p10 = scmp.ne.s32.totalorder %s5844_s5, %s4145_s24  ;;  %p4152_p4 = scmp.lt.u32.totalorder %s4145_s24, %s5844_s5 }
  0x54   : > { %p4148_p11 = pnand %p4146_p10, %p4922_p8 }
  0x56   : > { %p4149_p12 = pneg %p4148_p11 }
  0x58   : > { %p4154_p13 = pnand %p4152_p4, %p4149_p12 }
  0x5a   : > { %4157 = shalt.err (!%p4154_p13)
}
  0x5b   : > { %s4158_s3 = scalar_lea.vmem %s4902_s27, 16  ;;  %s4165_s11 = scalar_lea.vmem %s4902_s27, 32 }
  0x5c   : > { %p4159_p0 = scmp.ne.s32.totalorder %s4902_s27, %s4158_s3  ;;  %p4166_p7 = scmp.lt.s32.totalorder %s4902_s27, %s4902_s27 }
  0x5d   : > { %p4167_p9 = scmp.lt.s32.totalorder %s4165_s11, %s4158_s3 }
  0x5e   : > { %p4161_p2 = pnand %p4159_p0, %p4922_p8 }
  0x5f   : > { %p4168_p10 = por %p4167_p9, %p4166_p7 }
  0x60   : > { %p4162_p5 = pneg %p4161_p2 }
  0x62   : > { %p4169_p11 = pnand %p4168_p10, %p4162_p5 }
  0x64   : > { %4172 = shalt.err (!%p4169_p11)
}
  0x65   : > { %3929 = dma.hbm_to_vmem [thread:$0]  (!%p4906_p6), %s5844_s5, 16, %s4902_s27, [#allocation12]  }
  0x66   : > { %s5845_s7 = sld [smem:[#allocation52_spill]] }
  0x6c   : > { %s4173_s8 = scalar_lea.hbm %s5845_s7, 16 }
  0x6d   : > { %p4174_p12 = scmp.ne.s32.totalorder %s5845_s7, %s4173_s8  ;;  %p4180_p0 = scmp.lt.u32.totalorder %s4173_s8, %s5845_s7 }
  0x6f   : > { %p4176_p4 = pnand %p4174_p12, %p4922_p8 }
  0x71   : > { %p4177_p13 = pneg %p4176_p4 }
  0x73   : > { %p4182_p2 = pnand %p4180_p0, %p4177_p13 }
  0x75   : > { %4185 = shalt.err (!%p4182_p2)
}
  0x76   : > { %s4186_s27 = scalar_lea.vmem %s4910_s28, 16  ;;  %s4193_s23 = scalar_lea.vmem %s4910_s28, 32 }
  0x77   : > { %p4187_p5 = scmp.ne.s32.totalorder %s4910_s28, %s4186_s27  ;;  %p4194_p10 = scmp.lt.s32.totalorder %s4910_s28, %s4910_s28 }
  0x78   : > { %p4195_p11 = scmp.lt.s32.totalorder %s4193_s23, %s4186_s27 }
  0x79   : > { %p4189_p7 = pnand %p4187_p5, %p4922_p8 }
  0x7a   : > { %p4196_p12 = por %p4195_p11, %p4194_p10 }
  0x7b   : > { %p4190_p9 = pneg %p4189_p7 }
  0x7d   : > { %p4197_p4 = pnand %p4196_p12, %p4190_p9 }
  0x7f   : > { %4200 = shalt.err (!%p4197_p4)
}
  0x80   : > { %3935 = dma.hbm_to_vmem [thread:$0]  (!%p4906_p6), %s5845_s7, 16, %s4910_s28, [#allocation15]  }
  0x81   : > { %s4703_s20 = smov [#allocation20]   ;;  %s5846_s10 = sld [smem:[#allocation55_spill]] }
  0x82   : > { %s728_s8 = sshll.u32 %s4703_s20, 4  ;;  %s729_s8 = int_to_ptr.vmem [resolvable:$true] %s728_s8 }
  0x87   : > { %s4201_s3 = scalar_lea.hbm %s5846_s10, 16 }
  0x88   : > { %p4202_p13 = scmp.ne.s32.totalorder %s5846_s10, %s4201_s3  ;;  %p4208_p5 = scmp.lt.u32.totalorder %s4201_s3, %s5846_s10 }
  0x8a   : > { %p4204_p0 = pnand %p4202_p13, %p4922_p8 }
  0x8c   : > { %p4205_p2 = pneg %p4204_p0 }
  0x8e   : > { %p4210_p7 = pnand %p4208_p5, %p4205_p2 }
  0x90   : > { %4213 = shalt.err (!%p4210_p7)
}
  0x91   : > { %s4214_s28 = scalar_lea.vmem %s705_s0, 16  ;;  %s4221_s24 = scalar_lea.vmem %s705_s0, 32 }
  0x92   : > { %p4215_p9 = scmp.ne.s32.totalorder %s705_s0, %s4214_s28  ;;  %p4222_p12 = scmp.lt.s32.totalorder %s705_s0, %s705_s0 }
  0x93   : > { %p4223_p4 = scmp.lt.s32.totalorder %s4221_s24, %s4214_s28 }
  0x94   : > { %p4217_p10 = pnand %p4215_p9, %p4922_p8 }
  0x95   : > { %p4224_p1 = por %p4223_p4, %p4222_p12 }
  0x96   : > { %p4218_p11 = pneg %p4217_p10 }
  0x98   : > { %p4225_p3 = pnand %p4224_p1, %p4218_p11 }
  0x9a   : > { %4228 = shalt.err (!%p4225_p3)
}
  0x9b   : > { %3941 = dma.hbm_to_vmem [thread:$0]  (!%p4906_p6), %s5846_s10, 16, %s705_s0, [#allocation18]  }
  0x9c   : > { %s5847_s13 = sld [smem:[#allocation58_spill]] }
  0xa2   : > { %s4229_s25 = scalar_lea.hbm %s5847_s13, 512 }
  0xa3   : > { %p4230_p13 = scmp.ne.s32.totalorder %s5847_s13, %s4229_s25  ;;  %p4236_p3 = scmp.lt.u32.totalorder %s4229_s25, %s5847_s13 }
  0xa5   : > { %p4232_p0 = pnand %p4230_p13, %p4922_p8 }
  0xa7   : > { %p4233_p1 = pneg %p4232_p0 }
  0xa9   : > { %p4238_p2 = pnand %p4236_p3, %p4233_p1 }
  0xab   : > { %4241 = shalt.err (!%p4238_p2)
}
  0xac   : > { %s4242_s28 = scalar_lea.vmem %s729_s8, 512  ;;  %p4250_p10 = scmp.lt.s32.totalorder %s729_s8, %s729_s8 }
  0xad   : > { %p4243_p5 = scmp.ne.s32.totalorder %s729_s8, %s4242_s28  ;;  %p4251_p11 = scmp.lt.s32.totalorder %s4242_s28, %s4242_s28 }
  0xaf   : > { %p4245_p7 = pnand %p4243_p5, %p4922_p8  ;;  %p4252_p12 = por %p4251_p11, %p4250_p10 }
  0xb1   : > { %p4246_p9 = pneg %p4245_p7 }
  0xb3   : > { %p4253_p4 = pnand %p4252_p12, %p4246_p9 }
  0xb5   : > { %4256 = shalt.err (!%p4253_p4)
}
  0xb6   : > { %s5791_s0 = smov 128   ;;  %s5792_s24 = smov 8  }
  0xb7   : > { %3947 = dma.hbm_to_vmem [thread:$0]  (!%p4906_p6), %s5847_s13, 512, %s729_s8, [#allocation21], %s5791_s0, %s5791_s0, %s5792_s24  }
  0xb8   : > { %s4706_s5 = smov [#allocation23]   ;;  %s4707_s25 = smov [#allocation26]  }
  0xb9   : > { %s752_s21 = sshll.u32 %s4706_s5, 4  ;;  %s776_s3 = sshll.u32 %s4707_s25, 4  ;;  %s753_s21 = int_to_ptr.vmem [resolvable:$true] %s752_s21  ;;  %s777_s3 = int_to_ptr.vmem [resolvable:$true] %s776_s3 }
  0xba   : > { %s5848_s15 = sld [smem:[#allocation60_spill]] }
  0xc0   : > { %s4257_s23 = scalar_lea.hbm %s5848_s15, 512 }
  0xc1   : > { %p4258_p13 = scmp.ne.s32.totalorder %s5848_s15, %s4257_s23  ;;  %p4264_p3 = scmp.lt.u32.totalorder %s4257_s23, %s5848_s15 }
  0xc3   : > { %p4260_p0 = pnand %p4258_p13, %p4922_p8 }
  0xc5   : > { %p4261_p1 = pneg %p4260_p0 }
  0xc7   : > { %p4266_p2 = pnand %p4264_p3, %p4261_p1 }
  0xc9   : > { %4269 = shalt.err (!%p4266_p2)
}
  0xca   : > { %s4270_s8 = scalar_lea.vmem %s753_s21, 512  ;;  %p4278_p10 = scmp.lt.s32.totalorder %s753_s21, %s753_s21 }
  0xcb   : > { %p4271_p5 = scmp.ne.s32.totalorder %s753_s21, %s4270_s8  ;;  %p4279_p11 = scmp.lt.s32.totalorder %s4270_s8, %s4270_s8 }
  0xcd   : > { %p4273_p7 = pnand %p4271_p5, %p4922_p8  ;;  %p4280_p12 = por %p4279_p11, %p4278_p10 }
  0xcf   : > { %p4274_p9 = pneg %p4273_p7 }
  0xd1   : > { %p4281_p4 = pnand %p4280_p12, %p4274_p9 }
  0xd3   : > { %4284 = shalt.err (!%p4281_p4)
}
  0xd4   : > { %3953 = dma.hbm_to_vmem [thread:$0]  (!%p4906_p6), %s5848_s15, 512, %s753_s21, [#allocation24], %s5791_s0, %s5791_s0, %s5792_s24  }
  0xd5   : > { %s5849_s17 = sld [smem:[#allocation61_spill]] }
  0xdb   : > { %s4285_s20 = scalar_lea.hbm %s5849_s17, 512 }
  0xdc   : > { %p4286_p13 = scmp.ne.s32.totalorder %s5849_s17, %s4285_s20  ;;  %p4292_p3 = scmp.lt.u32.totalorder %s4285_s20, %s5849_s17 }
  0xde   : > { %p4288_p0 = pnand %p4286_p13, %p4922_p8 }
  0xe0   : > { %p4289_p1 = pneg %p4288_p0 }
  0xe2   : > { %p4294_p2 = pnand %p4292_p3, %p4289_p1 }
  0xe4   : > { %4297 = shalt.err (!%p4294_p2)
}
  0xe5   : > { %s4298_s23 = scalar_lea.vmem %s777_s3, 512  ;;  %p4306_p10 = scmp.lt.s32.totalorder %s777_s3, %s777_s3 }
  0xe6   : > { %p4299_p5 = scmp.ne.s32.totalorder %s777_s3, %s4298_s23  ;;  %p4307_p11 = scmp.lt.s32.totalorder %s4298_s23, %s4298_s23 }
  0xe8   : > { %p4301_p7 = pnand %p4299_p5, %p4922_p8  ;;  %p4308_p12 = por %p4307_p11, %p4306_p10 }
  0xea   : > { %p4302_p9 = pneg %p4301_p7 }
  0xec   : > { %p4309_p4 = pnand %p4308_p12, %p4302_p9 }
  0xee   : > { %4312 = shalt.err (!%p4309_p4)
}
  0xef   : > { %3959 = dma.hbm_to_vmem [thread:$0]  (!%p4906_p6), %s5849_s17, 512, %s777_s3, [#allocation27], %s5791_s0, %s5791_s0, %s5792_s24  }
  0xf0   : > { %s3475_s8 = sadd.s32 4294967294, %s4697_s30   ;;  %s5076_s10 = sadd.s32 1, %s4697_s30  }
  0xf1   : > { %5850 = sst [smem:[#allocation42_spill]] %s5076_s10  ;;  %s58_s22 = sadd.s32 1, %s4693_s6 }
  0xf2   : > { %s55_s7 = ssub.s32 %s4697_s30, %s5076_s10  ;;  %p65_p13 = scmp.ne.s32.totalorder %s4693_s6, %s4689_s2 }
  0xf3   : > { %p56_p0 = scmp.eq.s32.totalorder %s55_s7, 0  ;;  %p66_p1 = scmp.eq.s32.totalorder %s4697_s30, 0 }
  0xf4   : > { %p71_p3 = scmp.ne.s32.totalorder %s4689_s2, %s4685_s29  ;;  %p609_p2 = scmp.eq.s32.totalorder %s4888_s26, 1 }
  0xf5   : > { %s5088_s18 = scalar_select %p56_p0, %s4693_s6, %s58_s22  }
  0xf6   : > { %p67_p5 = por %p66_p1, %p65_p13  ;;  %p5852_p7 = scmp.eq.s32.totalorder %s4888_s26, 0 }
  0xf7   : > { %5851 = sst [smem:[#allocation43_spill]] %s5088_s18  ;;  %p5096_p10 = por %p609_p2, %p65_p13 }
  0xf8   : > { %p5092_p9 = por %p5852_p7, %p71_p3  ;;  %p615_p11 = scmp.eq.s32.totalorder %s3475_s8, 1 }
  0xf9   : > { %s5854_s20 = scalar_select %p5096_p10, 1, 0 }
  0xfa   : > { %s5853_s3 = scalar_select %p5092_p9, 1, 0 }
  0xfb   : > { %p3991_p12 = scmp.lt.s32.totalorder %s4697_s30, 2  ;;  %s5102_s5 = sand.u32 1, %s4693_s6  }
  0xfc   : > { %p5104_p4 = por %p615_p11, %p71_p3  ;;  %s5793_s11 = sshll.u32 %s5102_s5, 3 }
  0xfd   : > { %s5794_s27 = sshll.u32 %s4697_s30, 7  ;;  %p5110_p0 = pnand %p3991_p12, %p67_p5 }
  0xfe   : > { %s5855_s25 = scalar_select %p5104_p4, 1, 0 }
  0xff   : > { %s5857_s23 = scalar_select %p5110_p0, 1, 0 }
 0x100   : > { %5856 = sst [smem:[#allocation44_spill]] %s5855_s25  ;;  %s839_s21 = sand.u32 1, %s4697_s30  }
 0x101   : > { %s5858_s22 = sld [smem:[#allocation46_spill]]  ;;  %s843_s0 = scalar_lea.vmem [#allocation5], %s5793_s11 }
 0x102   : > { %s850_s24 = sshll.u32 %s843_s0, 4  ;;  %s5126_s13 = scalar_lea.sflag [#allocation6], %s839_s21  ;;  %s5124_s24 = int_to_ptr.vmem [resolvable:$true] %s850_s24 }
 0x103   : > { %p5132_p1 = pneg %p5110_p0 }
 0x105   : > { %s5859_s17 = scalar_select %p5132_p1, 1, 0 }
 0x107   : > { %s5120_s7 = scalar_lea.hbm %s5858_s22, %s5794_s27  ;;  %s4318_s11 = scalar_lea.hbm %s5858_s22, 256 }
 0x108   : > { %s4313_s15 = scalar_lea.hbm %s5120_s7, 128  ;;  %p4319_p5 = scmp.lt.u32.totalorder %s5120_s7, %s5858_s22 }
 0x109   : > { %p4314_p13 = scmp.ne.s32.totalorder %s5120_s7, %s4313_s15  ;;  %p4320_p7 = scmp.lt.u32.totalorder %s4318_s11, %s4313_s15 }
 0x10a   : > { %p4322_p12 = scmp.lt.u32.totalorder %s4313_s15, %s5120_s7 }
 0x10b   : > { %p4316_p3 = pnand %p5132_p1, %p4314_p13  ;;  %p4321_p11 = por %p4320_p7, %p4319_p5 }
 0x10d   : > { %p4317_p2 = pneg %p4316_p3  ;;  %p4323_p4 = por %p4322_p12, %p4321_p11 }
 0x10f   : > { %p4324_p10 = pnand %p4323_p4, %p4317_p2 }
 0x111   : > { %4327 = shalt.err (!%p4324_p10)
}
 0x112   : > { %s4328_s21 = scalar_lea.vmem %s5124_s24, 128  ;;  %s4708_s28 = smov [#allocation5]  }
 0x113   : > { %p4329_p13 = scmp.ne.s32.totalorder %s5124_s24, %s4328_s21  ;;  %s4333_s8 = sshll.u32 %s4708_s28, 4  ;;  %s4334_s8 = int_to_ptr.vmem [resolvable:$false] %s4333_s8 }
 0x114   : > { %s4335_s27 = scalar_lea.vmem %s4334_s8, 256  ;;  %p4336_p6 = scmp.lt.s32.totalorder %s5124_s24, %s4334_s8 }
 0x115   : > { %p4331_p3 = pnand %p4329_p13, %p5132_p1  ;;  %p4337_p8 = scmp.lt.s32.totalorder %s4335_s27, %s4328_s21 }
 0x117   : > { %p4332_p9 = pneg %p4331_p3  ;;  %p4338_p5 = por %p4337_p8, %p4336_p6 }
 0x119   : > { %p4339_p7 = pnand %p4338_p5, %p4332_p9 }
 0x11b   : > { %4342 = shalt.err (!%p4339_p7)
}
 0x11c   : > { %3969 = dma.hbm_to_vmem [thread:$0]  (!%p5110_p0), %s5120_s7, 128, %s5124_s24, %s5126_s13  }
 0x11d   : > { %s4709_s15 = smov [#allocation10]   ;;  %s4710_s0 = smov [#allocation13]  }
 0x11e   : > { %s646_s11 = sshll.u32 %s4709_s15, 4  ;;  %s668_s22 = sshll.u32 %s4710_s0, 4  ;;  %s647_s11 = int_to_ptr.vmem [resolvable:$true] %s646_s11  ;;  %s669_s22 = int_to_ptr.vmem [resolvable:$true] %s668_s22 }
 0x11f   : > { %s5860_s6 = sld [smem:[#allocation49_spill]]  ;;  %p5862_p8 = scmp.ne.s32.totalorder %s5843_s4, 0 }
 0x125   : > { %s5861_s10 = smov %s5860_s6  ;;  %s4343_s8 = scalar_lea.hbm %s5860_s6, 16 }
 0x126   : > { %p4344_p6 = scmp.ne.s32.totalorder %s5861_s10, %s4343_s8  ;;  %p4350_p4 = scmp.lt.u32.totalorder %s4343_s8, %s5861_s10 }
 0x128   : > { %p4346_p9 = pnand %p4344_p6, %p5862_p8 }
 0x12a   : > { %p4347_p10 = pneg %p4346_p9 }
 0x12c   : > { %p4352_p2 = pnand %p4350_p4, %p4347_p10 }
 0x12e   : > { %4355 = shalt.err (!%p4352_p2)
}
 0x12f   : > { %s4356_s24 = scalar_lea.vmem %s647_s11, 16  ;;  %s4363_s6 = scalar_lea.vmem %s647_s11, 32 }
 0x130   : > { %p4357_p11 = scmp.ne.s32.totalorder %s647_s11, %s4356_s24  ;;  %p4364_p3 = scmp.lt.s32.totalorder %s647_s11, %s647_s11 }
 0x131   : > { %p4365_p5 = scmp.lt.s32.totalorder %s4363_s6, %s4356_s24 }
 0x132   : > { %p4359_p12 = pnand %p4357_p11, %p5862_p8 }
 0x133   : > { %p4366_p7 = por %p4365_p5, %p4364_p3 }
 0x134   : > { %p4360_p13 = pneg %p4359_p12 }
 0x136   : > { %p4367_p0 = pnand %p4366_p7, %p4360_p13 }
 0x138   : > { %4370 = shalt.err (!%p4367_p0)
}
 0x139   : > { %p5863_p6 = scmp.ne.s32.totalorder %s5841_s9, 0  ;;  %s5864_s15 = sld [smem:[#allocation51_spill]] }
 0x13b   : > { %3926 = dma.hbm_to_vmem [thread:$0]  (!%p5863_p6), %s5861_s10, 16, %s647_s11, [#allocation9]  }
 0x13f   : > { %s4371_s0 = scalar_lea.hbm %s5864_s15, 16 }
 0x140   : > { %p4372_p9 = scmp.ne.s32.totalorder %s5864_s15, %s4371_s0  ;;  %p4378_p0 = scmp.lt.u32.totalorder %s4371_s0, %s5864_s15 }
 0x142   : > { %p4374_p10 = pnand %p4372_p9, %p5862_p8 }
 0x144   : > { %p4375_p4 = pneg %p4374_p10 }
 0x146   : > { %p4380_p2 = pnand %p4378_p0, %p4375_p4 }
 0x148   : > { %4383 = shalt.err (!%p4380_p2)
}
 0x149   : > { %s4384_s24 = scalar_lea.vmem %s669_s22, 16  ;;  %s4391_s11 = scalar_lea.vmem %s669_s22, 32 }
 0x14a   : > { %p4385_p11 = scmp.ne.s32.totalorder %s669_s22, %s4384_s24  ;;  %p4392_p3 = scmp.lt.s32.totalorder %s669_s22, %s669_s22 }
 0x14b   : > { %p4393_p5 = scmp.lt.s32.totalorder %s4391_s11, %s4384_s24 }
 0x14c   : > { %p4387_p12 = pnand %p4385_p11, %p5862_p8 }
 0x14d   : > { %p4394_p7 = por %p4393_p5, %p4392_p3 }
 0x14e   : > { %p4388_p13 = pneg %p4387_p12 }
 0x150   : > { %p4395_p1 = pnand %p4394_p7, %p4388_p13 }
 0x152   : > { %4398 = shalt.err (!%p4395_p1)
}
 0x153   : > { %3932 = dma.hbm_to_vmem [thread:$0]  (!%p5863_p6), %s5864_s15, 16, %s669_s22, [#allocation12]  }
 0x154   : > { %s4711_s7 = smov [#allocation16]   ;;  %s4712_s25 = smov [#allocation19]  }
 0x155   : > { %s690_s29 = sshll.u32 %s4711_s7, 4  ;;  %s718_s0 = sshll.u32 %s4712_s25, 4  ;;  %s691_s29 = int_to_ptr.vmem [resolvable:$true] %s690_s29  ;;  %s719_s0 = int_to_ptr.vmem [resolvable:$true] %s718_s0 }
 0x156   : > { %s5865_s21 = sld [smem:[#allocation53_spill]] }
 0x15c   : > { %s4399_s27 = scalar_lea.hbm %s5865_s21, 16 }
 0x15d   : > { %p4400_p1 = scmp.ne.s32.totalorder %s5865_s21, %s4399_s27  ;;  %p4406_p4 = scmp.lt.u32.totalorder %s4399_s27, %s5865_s21 }
 0x15f   : > { %p4402_p9 = pnand %p4400_p1, %p5862_p8 }
 0x161   : > { %p4403_p10 = pneg %p4402_p9 }
 0x163   : > { %p4408_p0 = pnand %p4406_p4, %p4403_p10 }
 0x165   : > { %4411 = shalt.err (!%p4408_p0)
}
 0x166   : > { %s4412_s22 = scalar_lea.vmem %s691_s29, 16  ;;  %s4419_s18 = scalar_lea.vmem %s691_s29, 32 }
 0x167   : > { %p4413_p2 = scmp.ne.s32.totalorder %s691_s29, %s4412_s22  ;;  %p4420_p13 = scmp.lt.s32.totalorder %s691_s29, %s691_s29 }
 0x168   : > { %p4421_p3 = scmp.lt.s32.totalorder %s4419_s18, %s4412_s22 }
 0x169   : > { %p4415_p11 = pnand %p4413_p2, %p5862_p8 }
 0x16a   : > { %p4422_p5 = por %p4421_p3, %p4420_p13 }
 0x16b   : > { %p4416_p12 = pneg %p4415_p11 }
 0x16d   : > { %p4423_p7 = pnand %p4422_p5, %p4416_p12 }
 0x16f   : > { %4426 = shalt.err (!%p4423_p7)
}
 0x170   : > { %3938 = dma.hbm_to_vmem [thread:$0]  (!%p5863_p6), %s5865_s21, 16, %s691_s29, [#allocation15]  }
 0x171   : > { %s5866_s12 = sld [smem:[#allocation57_spill]] }
 0x177   : > { %s4427_s8 = scalar_lea.hbm %s5866_s12, 16 }
 0x178   : > { %p4428_p1 = scmp.ne.s32.totalorder %s5866_s12, %s4427_s8  ;;  %p4434_p4 = scmp.lt.u32.totalorder %s4427_s8, %s5866_s12 }
 0x17a   : > { %p4430_p9 = pnand %p4428_p1, %p5862_p8 }
 0x17c   : > { %p4431_p10 = pneg %p4430_p9 }
 0x17e   : > { %p4436_p0 = pnand %p4434_p4, %p4431_p10 }
 0x180   : > { %4439 = shalt.err (!%p4436_p0)
}
 0x181   : > { %s4440_s22 = scalar_lea.vmem %s719_s0, 16  ;;  %s4447_s29 = scalar_lea.vmem %s719_s0, 32 }
 0x182   : > { %p4441_p2 = scmp.ne.s32.totalorder %s719_s0, %s4440_s22  ;;  %p4448_p13 = scmp.lt.s32.totalorder %s719_s0, %s719_s0 }
 0x183   : > { %p4449_p3 = scmp.lt.s32.totalorder %s4447_s29, %s4440_s22 }
 0x184   : > { %p4443_p11 = pnand %p4441_p2, %p5862_p8 }
 0x185   : > { %p4450_p5 = por %p4449_p3, %p4448_p13 }
 0x186   : > { %p4444_p12 = pneg %p4443_p11 }
 0x188   : > { %p4451_p7 = pnand %p4450_p5, %p4444_p12 }
 0x18a   : > { %4454 = shalt.err (!%p4451_p7)
}
 0x18b   : > { %3944 = dma.hbm_to_vmem [thread:$0]  (!%p5863_p6), %s5866_s12, 16, %s719_s0, [#allocation18]  }
 0x18c   : > { %s4713_s25 = smov [#allocation22]   ;;  %s4714_s28 = smov [#allocation25]  }
 0x18d   : > { %s742_s10 = sshll.u32 %s4713_s25, 4  ;;  %s766_s8 = sshll.u32 %s4714_s28, 4  ;;  %s743_s10 = int_to_ptr.vmem [resolvable:$true] %s742_s10  ;;  %s767_s8 = int_to_ptr.vmem [resolvable:$true] %s766_s8 }
 0x18e   : > { %s5867_s14 = sld [smem:[#allocation59_spill]] }
 0x194   : > { %s4455_s11 = scalar_lea.hbm %s5867_s14, 16 }
 0x195   : > { %p4456_p1 = scmp.ne.s32.totalorder %s5867_s14, %s4455_s11  ;;  %p4462_p4 = scmp.lt.u32.totalorder %s4455_s11, %s5867_s14 }
 0x197   : > { %p4458_p9 = pnand %p4456_p1, %p5862_p8 }
 0x199   : > { %p4459_p10 = pneg %p4458_p9 }
 0x19b   : > { %p4464_p0 = pnand %p4462_p4, %p4459_p10 }
 0x19d   : > { %4467 = shalt.err (!%p4464_p0)
}
 0x19e   : > { %s4468_s0 = scalar_lea.vmem %s743_s10, 16  ;;  %s4475_s7 = scalar_lea.vmem %s743_s10, 32 }
 0x19f   : > { %p4469_p2 = scmp.ne.s32.totalorder %s743_s10, %s4468_s0  ;;  %p4476_p13 = scmp.lt.s32.totalorder %s743_s10, %s743_s10 }
 0x1a0   : > { %p4477_p3 = scmp.lt.s32.totalorder %s4475_s7, %s4468_s0 }
 0x1a1   : > { %p4471_p11 = pnand %p4469_p2, %p5862_p8 }
 0x1a2   : > { %p4478_p5 = por %p4477_p3, %p4476_p13 }
 0x1a3   : > { %p4472_p12 = pneg %p4471_p11 }
 0x1a5   : > { %p4479_p7 = pnand %p4478_p5, %p4472_p12 }
 0x1a7   : > { %4482 = shalt.err (!%p4479_p7)
}
 0x1a8   : > { %3950 = dma.hbm_to_vmem [thread:$0]  (!%p5863_p6), %s5867_s14, 16, %s743_s10, [#allocation21]  }
 0x1a9   : > { %s4483_s11 = scalar_lea.hbm %s5762_s16, 16 }
 0x1aa   : > { %p4484_p1 = scmp.ne.s32.totalorder %s5762_s16, %s4483_s11  ;;  %p4490_p4 = scmp.lt.u32.totalorder %s4483_s11, %s5762_s16 }
 0x1ac   : > { %p4486_p9 = pnand %p4484_p1, %p5862_p8 }
 0x1ae   : > { %p4487_p10 = pneg %p4486_p9 }
 0x1b0   : > { %p4492_p0 = pnand %p4490_p4, %p4487_p10 }
 0x1b2   : > { %4495 = shalt.err (!%p4492_p0)
}
 0x1b3   : > { %s4496_s0 = scalar_lea.vmem %s767_s8, 16  ;;  %s4503_s10 = scalar_lea.vmem %s767_s8, 32 }
 0x1b4   : > { %p4497_p2 = scmp.ne.s32.totalorder %s767_s8, %s4496_s0  ;;  %p4504_p13 = scmp.lt.s32.totalorder %s767_s8, %s767_s8 }
 0x1b5   : > { %p4505_p3 = scmp.lt.s32.totalorder %s4503_s10, %s4496_s0 }
 0x1b6   : > { %p4499_p11 = pnand %p4497_p2, %p5862_p8 }
 0x1b7   : > { %p4506_p5 = por %p4505_p3, %p4504_p13 }
 0x1b8   : > { %p4500_p12 = pneg %p4499_p11 }
 0x1ba   : > { %p4507_p7 = pnand %p4506_p5, %p4500_p12 }
 0x1bc   : > { %4510 = shalt.err (!%p4507_p7)
}
 0x1bd   : > { %3956 = dma.hbm_to_vmem [thread:$0]  (!%p5863_p6), %s5762_s16, 16, %s767_s8, [#allocation24]  }
 0x1be   : > { %s4715_s28 = smov [#allocation28]   ;;  %s4511_s6 = scalar_lea.hbm %s5765_s19, 512 }
 0x1bf   : > { %s792_s27 = sshll.u32 %s4715_s28, 4  ;;  %p4512_p1 = scmp.ne.s32.totalorder %s5765_s19, %s4511_s6  ;;  %s793_s27 = int_to_ptr.vmem [resolvable:$true] %s792_s27 }
 0x1c0   : > { %p4518_p4 = scmp.lt.u32.totalorder %s4511_s6, %s5765_s19 }
 0x1c1   : > { %p4514_p9 = pnand %p4512_p1, %p5862_p8 }
 0x1c3   : > { %p4515_p10 = pneg %p4514_p9 }
 0x1c5   : > { %p4520_p0 = pnand %p4518_p4, %p4515_p10 }
 0x1c7   : > { %4523 = shalt.err (!%p4520_p0)
}
 0x1c8   : > { %s4524_s8 = scalar_lea.vmem %s793_s27, 512  ;;  %p4532_p13 = scmp.lt.s32.totalorder %s793_s27, %s793_s27 }
 0x1c9   : > { %p4525_p2 = scmp.ne.s32.totalorder %s793_s27, %s4524_s8  ;;  %p4533_p3 = scmp.lt.s32.totalorder %s4524_s8, %s4524_s8 }
 0x1cb   : > { %p4527_p11 = pnand %p4525_p2, %p5862_p8  ;;  %p4534_p5 = por %p4533_p3, %p4532_p13 }
 0x1cd   : > { %p4528_p12 = pneg %p4527_p11 }
 0x1cf   : > { %p4535_p7 = pnand %p4534_p5, %p4528_p12 }
 0x1d1   : > { %4538 = shalt.err (!%p4535_p7)
}
 0x1d2   : > { %s5868_s10 = smov 8   ;;  %s5869_s7 = smov 128  }
 0x1d3   : > { %3962 = dma.hbm_to_vmem [thread:$0]  (!%p5863_p6), %s5765_s19, 512, %s793_s27, [#allocation27], %s5869_s7, %s5869_s7, %s5868_s10  }
 0x1d4   : > { %s5870_s4 = sshll.u32 %s4697_s30, 7  ;;  %s5871_s6 = sld [smem:[#allocation45_spill]] }
 0x1d5   : > { %s5873_s18 = sshll.u32 %s5102_s5, 3  ;;  %s822_s8 = scalar_lea.sflag [#allocation3], %s5102_s5 }
 0x1d6   : > { %s825_s9 = scalar_lea.vmem [#allocation2], %s5873_s18  ;;  %p5874_p1 = scmp.ne.s32.totalorder %s5859_s17, 0 }
 0x1d7   : > { %s832_s0 = sshll.u32 %s825_s9, 4  ;;  %s833_s0 = int_to_ptr.vmem [resolvable:$true] %s832_s0 }
 0x1da   : > { %s5872_s22 = smov %s5871_s6  ;;  %s5290_s29 = scalar_lea.hbm %s5871_s6, %s5870_s4 }
 0x1db   : > { %s4539_s25 = scalar_lea.hbm %s5290_s29, 128  ;;  %s4544_s7 = scalar_lea.hbm %s5872_s22, 256 }
 0x1dc   : > { %p4540_p8 = scmp.ne.s32.totalorder %s5290_s29, %s4539_s25  ;;  %p4545_p10 = scmp.lt.u32.totalorder %s5290_s29, %s5872_s22 }
 0x1dd   : > { %p4546_p4 = scmp.lt.u32.totalorder %s4544_s7, %s4539_s25  ;;  %p4548_p2 = scmp.lt.u32.totalorder %s4539_s25, %s5290_s29 }
 0x1de   : > { %p4542_p9 = pnand %p4540_p8, %p5874_p1 }
 0x1df   : > { %p4547_p0 = por %p4546_p4, %p4545_p10 }
 0x1e0   : > { %p4543_p6 = pneg %p4542_p9 }
 0x1e1   : > { %p4549_p11 = por %p4548_p2, %p4547_p0 }
 0x1e3   : > { %p4550_p12 = pnand %p4549_p11, %p4543_p6 }
 0x1e5   : > { %4553 = shalt.err (!%p4550_p12)
}
 0x1e6   : > { %s4554_s24 = scalar_lea.vmem %s833_s0, 128  ;;  %s4716_s11 = smov [#allocation2]  }
 0x1e7   : > { %p4555_p13 = scmp.ne.s32.totalorder %s833_s0, %s4554_s24  ;;  %s4559_s6 = sshll.u32 %s4716_s11, 4  ;;  %s4560_s6 = int_to_ptr.vmem [resolvable:$false] %s4559_s6 }
 0x1e8   : > { %s4561_s18 = scalar_lea.vmem %s4560_s6, 256  ;;  %p4562_p7 = scmp.lt.s32.totalorder %s833_s0, %s4560_s6 }
 0x1e9   : > { %p4557_p3 = pnand %p4555_p13, %p5874_p1  ;;  %p4563_p8 = scmp.lt.s32.totalorder %s4561_s18, %s4554_s24 }
 0x1eb   : > { %p4558_p5 = pneg %p4557_p3  ;;  %p4564_p9 = por %p4563_p8, %p4562_p7 }
 0x1ed   : > { %p4565_p4 = pnand %p4564_p9, %p4558_p5 }
 0x1ef   : > { %4568 = shalt.err (!%p4565_p4)
}
 0x1f0   : > { %p5875_p10 = scmp.ne.s32.totalorder %s5857_s23, 0  ;;  %s3496_s9 = sshll.u32 %s4697_s30, 4 }
 0x1f1   : > { %s860_s25 = scalar_lea.vmem [#allocation7], %s5102_s5  ;;  %s5876_s28 = sld [smem:[#allocation47_spill]] }
 0x1f2   : > { %3966 = dma.hbm_to_vmem [thread:$0]  (!%p5875_p10), %s5290_s29, 128, %s833_s0, %s822_s8  }
 0x1f3   : > { %s867_s27 = sshll.u32 %s860_s25, 4  ;;  %s868_s27 = int_to_ptr.vmem [resolvable:$true] %s867_s27 }
 0x1f7   : > { %s865_s4 = scalar_lea.hbm %s5876_s28, %s3496_s9  ;;  %s4574_s18 = scalar_lea.hbm %s5876_s28, 32 }
 0x1f8   : > { %s4569_s11 = scalar_lea.hbm %s865_s4, 16  ;;  %p4575_p11 = scmp.lt.u32.totalorder %s865_s4, %s5876_s28 }
 0x1f9   : > { %p4570_p6 = scmp.ne.s32.totalorder %s865_s4, %s4569_s11  ;;  %p4576_p12 = scmp.lt.u32.totalorder %s4574_s18, %s4569_s11 }
 0x1fa   : > { %p4578_p3 = scmp.lt.u32.totalorder %s4569_s11, %s865_s4 }
 0x1fb   : > { %p4572_p0 = pnand %p4570_p6, %p5874_p1  ;;  %p4577_p13 = por %p4576_p12, %p4575_p11 }
 0x1fd   : > { %p4573_p2 = pneg %p4572_p0  ;;  %p4579_p5 = por %p4578_p3, %p4577_p13 }
 0x1ff   : > { %p4580_p7 = pnand %p4579_p5, %p4573_p2 }
 0x201   : > { %4583 = shalt.err (!%p4580_p7)
}
 0x202   : > { %s4584_s5 = scalar_lea.vmem %s868_s27, 16  ;;  %s4717_s29 = smov [#allocation7]  }
 0x203   : > { %p4585_p8 = scmp.ne.s32.totalorder %s868_s27, %s4584_s5  ;;  %s4589_s0 = sshll.u32 %s4717_s29, 4  ;;  %s4590_s0 = int_to_ptr.vmem [resolvable:$false] %s4589_s0 }
 0x204   : > { %s4591_s8 = scalar_lea.vmem %s4590_s0, 32  ;;  %p4592_p6 = scmp.lt.s32.totalorder %s868_s27, %s4590_s0 }
 0x205   : > { %p4587_p9 = pnand %p4585_p8, %p5874_p1  ;;  %p4593_p0 = scmp.lt.s32.totalorder %s4591_s8, %s4584_s5 }
 0x207   : > { %p4588_p4 = pneg %p4587_p9  ;;  %p4594_p10 = por %p4593_p0, %p4592_p6 }
 0x209   : > { %p4595_p11 = pnand %p4594_p10, %p4588_p4 }
 0x20b   : > { %4598 = shalt.err (!%p4595_p11)
}
 0x20c   : > { %p5877_p12 = scmp.ne.s32.totalorder %s5857_s23, 0  ;;  %p5878_p2 = scmp.ne.s32.totalorder %s5840_s1, 0 }
 0x20d   : > { %s5333_s12 = sand.u32 (!%p5878_p2), 1, %s4689_s2   ;;  %p5879_p1 = scmp.ne.s32.totalorder (!%p5878_p2), %s5853_s3, 0 }
 0x20e   : > { %3972 = dma.hbm_to_vmem [thread:$0]  (!%p5877_p12), %s865_s4, 16, %s868_s27, %s5126_s13  }
 0x20f   : > { %876 = sbr.rel (%p5878_p2) target bundleno = 5016 (0x1398), region = 120  ;;  %s5336_s14 = sshll.u32 (!%p5878_p2), %s5333_s12, 3 }
 0x210   : > { %s879_s17 = scalar_lea.sflag (!%p5878_p2), [#allocation3], %s5333_s12  ;;  %s882_s9 = scalar_lea.vmem (!%p5878_p2), [#allocation2], %s5336_s14 }
 0x216   : > { %4644 = dma.done.wait (%p5879_p1), %s879_s17, 128  }
 0x217   : > { %4646 = vsyncadd (%p5879_p1), %s879_s17, 4294967168  ;;  %s887_s13 = sand.u32 1, %s4888_s26   ;;  %s891_s23 = scalar_lea.vmem [#allocation5], %s5336_s14 }
 0x218   : > { %s888_s1 = scalar_lea.sflag [#allocation6], %s887_s13 }
 0x219   : > { %4648 = dma.done.wait (%p5879_p1), %s888_s1, 144  }
 0x21a   : > { %4650 = vsyncadd (%p5879_p1), %s888_s1, 4294967152  ;;  %s899_s25 = scalar_lea.vmem [#allocation7], %s5333_s12  ;;  %p5880_p10 = scmp.eq.s32.totalorder %s4888_s26, 0 }
 0x21c   : > { %4652 = dma.done.wait (%p5880_p10), [#allocation9], 32   ;;  %p5881_p13 = pmov %p5880_p10 }
 0x21d   : > { %p5882_p3 = pmov %p5880_p10 }
 0x21e   : > { %4654 = vsyncadd (%p5881_p13), [#allocation9], 4294967264 }
 0x21f   : > { %4656 = dma.done.wait (%p5882_p3), [#allocation12], 32   ;;  %p5883_p5 = pmov %p5882_p3 }
 0x220   : > { %p5884_p7 = pmov %p5882_p3 }
 0x221   : > { %4658 = vsyncadd (%p5883_p5), [#allocation12], 4294967264 }
 0x222   : > { %4660 = dma.done.wait (%p5884_p7), [#allocation15], 32   ;;  %p5885_p8 = pmov %p5882_p3 }
 0x223   : > { %p5886_p9 = pmov %p5882_p3 }
 0x224   : > { %4662 = vsyncadd (%p5885_p8), [#allocation15], 4294967264 }
 0x225   : > { %4664 = dma.done.wait (%p5886_p9), [#allocation18], 32   ;;  %p5887_p4 = pmov %p5882_p3 }
 0x226   : > { %p5888_p6 = pmov %p5882_p3 }
 0x227   : > { %4666 = vsyncadd (%p5887_p4), [#allocation18], 4294967264 }
 0x228   : > { %4668 = dma.done.wait (%p5888_p6), [#allocation21], 528   ;;  %p5889_p0 = pmov %p5882_p3 }
 0x22a   : > { %4670 = vsyncadd (%p5889_p0), [#allocation21], 4294966768  ;;  %p5890_p11 = pmov %p5889_p0 }
 0x22b   : > { %p5891_p12 = pmov %p5889_p0 }
 0x22c   : > { %4672 = dma.done.wait (%p5890_p11), [#allocation24], 528  }
 0x22d   : > { %4674 = vsyncadd (%p5891_p12), [#allocation24], 4294966768  ;;  %p5892_p2 = pmov %p5889_p0 }
 0x22e   : > { %p5893_p1 = pmov %p5889_p0 }
 0x22f   : > { %4676 = dma.done.wait (%p5892_p2), [#allocation27], 1024  }
 0x230   : > { %4678 = vsyncadd (%p5893_p1), [#allocation27], 4294966272  ;;  %vm1061_vm0 = vcmask 261120   ;;  %v5379_v0 = vld [vmem:[%s882_s9] sm:$0xff]  ;;  %s5894_s10 = sld [smem:[#allocation66_spill]]  ;;  %s5895_s27 = sld [smem:[#allocation54_spill]] }
 0x231   : > { %v1138_v1 = vsel %vm1061_vm0, %v5379_v0, 0.0  ;;  %v1033_v2 = vld [vmem:[%s899_s25] sm:$0x1]  ;;  %v4718_v29 = vmov 0.0   ;;  %v4719_v31 = vmov 0.0|0.0   ;;  %vm4720_vm1 = vmmov 0  }
 0x232   : > { %1139 = vadd.xlane.f32.xlu0 %v1138_v1  ;;  %v1034_v3 = vmul.f32 1.442695, %v1033_v2  ;;  %1129 = vmatprep.mubr.f32.mxu1 %v4718_v29  ;;  %v3516_v39 = vld [vmem:[#allocation8] ss:$0 sm:$0xff]  ;;  %v3517_v41 = vld [vmem:[#allocation10] ss:$0 sm:$0xff] }
 0x233   : > { %3646 = vmatprep.subr.mxu0 %v4718_v29  ;;  %3648 = vmatprep.mubr.msk.f32.mxu0 %vm4720_vm1, %v4718_v29  ;;  %v3518_v46 = vld [vmem:[#allocation17] ss:$0 sm:$0xff]  ;;  %s4721_s5 = smov 96   ;;  %s4722_s29 = smov 120   ;;  %vm1254_vm2 = vcmask 64512   ;;  %vm1925_vm3 = vcmask 130048  }
 0x234   : > { %4073 = vpow2.f32 %v1034_v3  ;;  %s4723_s0 = smov 88   ;;  %s4724_s8 = smov 80   ;;  %vm1927_vm4 = vcmask 195584   ;;  %vm3127_vm5 = vcmask 523264  }
 0x235   : > { %s4725_s17 = smov 72   ;;  %s4726_s9 = smov 112  }
 0x236   : > { %v1042_v13 = vld [vmem:[%s5894_s10 + $0x8] sm:$0xff]  ;;  %v1044_v14 = vld [vmem:[%s5894_s10 + $0x18] sm:$0xff]  ;;  %v1041_v16 = vld [vmem:[%s5894_s10] sm:$0xff]  ;;  %s4727_s13 = smov 104   ;;  %s5812_s1 = smov 64  }
 0x237   : > { %v3800_v15 = vpack.c.bf16 %v1044_v14, %v1042_v13  ;;  %v1043_v17 = vld [vmem:[%s5894_s10 + $0x10] sm:$0xff]  ;;  %v1046_v19 = vld [vmem:[%s5894_s10 + $0x28] sm:$0xff]  ;;  %v1048_v20 = vld [vmem:[%s5894_s10 + $0x38] sm:$0xff]  ;;  %s4729_s25 = smov 48   ;;  %s4730_s3 = smov 40  }
 0x238   : > { %v3802_v18 = vpack.c.bf16 %v1043_v17, %v1041_v16  ;;  %v3804_v21 = vpack.c.bf16 %v1048_v20, %v1046_v19  ;;  %v1045_v22 = vld [vmem:[%s5894_s10 + $0x20] sm:$0xff]  ;;  %v1047_v23 = vld [vmem:[%s5894_s10 + $0x30] sm:$0xff]  ;;  %v1167_v28 = vld [vmem:[%s5895_s27 + $0x8] sm:$0xff]  ;;  %s4731_s7 = smov 56   ;;  %s5896_s24 = sld [smem:[#allocation56_spill]] }
 0x239   : > { %3801 = vmatprep.subr.bf16.mxu1 %v3800_v15  ;;  %v3806_v24 = vpack.c.bf16 %v1047_v23, %v1045_v22  ;;  %v1166_v27 = vld [vmem:[%s5895_s27] sm:$0xff]  ;;  %v1168_v32 = vld [vmem:[%s5895_s27 + $0x10] sm:$0xff]  ;;  %v1169_v33 = vld [vmem:[%s5895_s27 + $0x18] sm:$0xff]  ;;  %s5897_s6 = sld [smem:[#allocation67_spill]]  ;;  %s4732_s18 = smov 8  }
 0x23a   : > { %3803 = vmatpush1.bf16.msra.mxu1 %v3802_v18  ;;  %v3809_v30 = vpack.c.bf16 %v1167_v28, %v1166_v27  ;;  %v3812_v34 = vpack.c.bf16 %v1169_v33, %v1168_v32  ;;  %p5904_p13 = scmp.ne.s32.totalorder %s5854_s20, 0 }
 0x23b   : > { %3805 = vmatprep.subr.bf16.mxu1 %v3804_v21 }
 0x23e   : > { %v4074_v8 = vpop.eup %4073  ;;  %3807 = vmatpush1.bf16.msra.mxu1 %v3806_v24 }
 0x23f   : > { %v1036_v10 = vadd.f32 1.0, %v4074_v8  ;;  %3808 = vmatprep.subr.bf16.mxu1 %v4719_v31 }
 0x241   : > { %4075 = vlog2.f32 %v1036_v10 }
 0x24b   : > { %v4076_v11 = vpop.eup %4075 }
 0x24c   : > { %v1038_v12 = vmul.f32 0.6931472, %v4076_v11 }
 0x24e   : > { %4077 = vtanh.f32 %v1038_v12 }
 0x258   : > { %v4078_v25 = vpop.eup %4077 }
 0x259   : > { %v1040_v26 = vmul.f32 %v4078_v25, %v1033_v2 }
 0x25b   : > { %3515 = vmatmul.mubr.msk.f32.vlgmr.msra.gmra.mrb[0].mxu1 %vm1061_vm0, %v1040_v26 }
 0x25c   : > { %3810 = vmatpush3.bf16.msra.mxu1 %v3809_v30  ;;  %3643 = vmatprep.mubr.msk.f32.mxu1 %vm4720_vm1, %v4718_v29 }
 0x25d   : > { %3811 = vmatprep.subr.bf16.mxu1 %v4719_v31 }
 0x260   : > { %3813 = vmatpush3.bf16.msra.mxu1 %v3812_v34 }
 0x261   : > { %3651 = vmatprep.subr.mxu1 %v4718_v29 }
 0x2bf   : > { %v1140_v4 = vpop.xlane.xlu0 %1139 }
 0x2c0   : > { %v1142_v5 = vmul.f32 0.03125, %v1140_v4 }
 0x2c2   : > { %v1143_v6 = vsub.f32 %v5379_v0, %v1142_v5 }
 0x2c4   : > { %v1144_v7 = vmul.f32 %v1143_v6, %v1143_v6 }
 0x2c6   : > { %v1145_v9 = vsel %vm1061_vm0, %v1144_v7, 0.0 }
 0x2c7   : > { %1146 = vadd.xlane.f32.xlu0 %v1145_v9 }
 0x32e   : > { %v5434_v44 = vpop.f32.mrb[0].mxu1 }
 0x32f   : > { %v5436_v45 = vpop.f32.mrb[1].mxu1 }
 0x354   : > { %v1147_v35 = vpop.xlane.xlu0 %1146 }
 0x355   : > { %v1148_v36 = vmul.f32 0.03125, %v1147_v35 }
 0x357   : > { %v1149_v37 = vadd.f32 1e-05, %v1148_v36 }
 0x359   : > { %4079 = vrsqrt.f32 %v1149_v37 }
 0x363   : > { %v4080_v38 = vpop.eup %4079 }
 0x364   : > { %v1151_v40 = vmul.f32 %v4080_v38, %v1143_v6 }
 0x366   : > { %v1158_v42 = vmul.f32 %v3516_v39, %v1151_v40 }
 0x368   : > { %v1165_v43 = vadd.f32 %v3517_v41, %v1158_v42 }
 0x36a   : > { %3644 = vmatmul.mubr.msk.f32.vlgmr.msra.gmra.mrb[2].mxu1 %vm1061_vm0, %v1165_v43 }
 0x36b   : > { %3653 = vmatprep.mubr.msk.f32.mxu1 %vm4720_vm1, %v4718_v29 }
 0x43d   : > { %v1246_v47 = vpop.f32.mrb[2].mxu1 }
 0x43e   : > { %v5438_v48 = vadd.f32 %v3518_v46, %v1246_v47  ;;  %v3645_v49 = vpop.f32.mrb[3].mxu1  ;;  %v1051_v47 = vlaneseq }
 0x43f   : > { %v1930_v49 = vld [vmem:[%s5896_s24 + $0x8] sm:$0xff] }
 0x440   : > { %1252 = vrot.lane.b32.xlu1 %v5438_v48, %s4721_s5  ;;  %v1250_v50 = vmul.f32 0.35355338, %v5438_v48 }
 0x442   : > { %1417 = vrot.lane.b32.xlu0 %v1250_v50, %s4722_s29 }
 0x444   : > { %1419 = vrot.lane.b32.xlu1 %v5438_v48, %s4723_s0 }
 0x448   : > { %1584 = vrot.lane.b32.xlu1 %v5438_v48, %s4724_s8 }
 0x44c   : > { %1749 = vrot.lane.b32.xlu1 %v5438_v48, %s4725_s17 }
 0x450   : > { %1582 = vrot.lane.b32.xlu1 %v1250_v50, %s4726_s9 }
 0x454   : > { %1747 = vrot.lane.b32.xlu1 %v1250_v50, %s4727_s13 }
 0x4b2   : > { %v1253_v51 = vpop.permute.xlu1 %1252 }
 0x4b3   : > { %3647 = vmatpush3.xpose.msk.msra.mxu0 %vm1254_vm2, %v1253_v51  ;;  %v5507_v51 = vshrl.u32 %v1051_v47, 7 }
 0x4b4   : > { %3656 = vmatprep.subr.mxu0 %v4718_v29  ;;  %v1418_v53 = vpop.permute.xlu0 %1417 }
 0x4b6   : > { %v1420_v52 = vpop.permute.xlu1 %1419  ;;  %3649 = vmatmul.mubr.msk.f32.vlgmr.msra.gmra.mrb[0].mxu0 %vm1254_vm2, %v1250_v50 }
 0x4b7   : > { %3657 = vmatpush3.xpose.msk.msra.mxu0 %vm1254_vm2, %v1420_v52  ;;  %3658 = vmatprep.mubr.msk.f32.mxu0 %vm4720_vm1, %v4718_v29 }
 0x4b8   : > { %3666 = vmatprep.subr.mxu0 %v4718_v29 }
 0x4ba   : > { %v1585_v54 = vpop.permute.xlu1 %1584  ;;  %3659 = vmatmul.mubr.msk.f32.vlgmr.msra.gmra.mrb[2].mxu0 %vm1254_vm2, %v1418_v53 }
 0x4bb   : > { %3667 = vmatpush3.xpose.msk.msra.mxu0 %vm1254_vm2, %v1585_v54  ;;  %3668 = vmatprep.mubr.msk.f32.mxu0 %vm4720_vm1, %v4718_v29  ;;  %v1931_v54 = vld [vmem:[%s5896_s24 + $0x10] sm:$0xff] }
 0x4bc   : > { %3676 = vmatprep.subr.mxu0 %v4718_v29 }
 0x4be   : > { %v1750_v55 = vpop.permute.xlu1 %1749 }
 0x4c2   : > { %v1583_v56 = vpop.permute.xlu1 %1582 }
 0x4c3   : > { %3669 = vmatmul.mubr.msk.f32.vlgmr.msra.gmra.mrb[4].mxu0 %vm1254_vm2, %v1583_v56 }
 0x4c4   : > { %3677 = vmatpush3.xpose.msk.msra.mxu0 %vm1254_vm2, %v1750_v55  ;;  %3678 = vmatprep.mubr.msk.f32.mxu0 %vm4720_vm1, %v4718_v29  ;;  %v1932_v55 = vld [vmem:[%s5896_s24 + $0x18] sm:$0xff] }
 0x4c5   : > { %3814 = vmatprep.subr.bf16.mxu0 %v4719_v31  ;;  %v3818_v56 = vpack.c.bf16 %v1932_v55, %v1931_v54 }
 0x4c6   : > { %v1748_v57 = vpop.permute.xlu1 %1747 }
 0x4c7   : > { %3679 = vmatmul.mubr.msk.f32.vlgmr.msra.gmra.mrb[6].mxu0 %vm1254_vm2, %v1748_v57  ;;  %v5517_v57 = vsub.s32 0, %v5507_v51 }
 0x4c8   : > { %3694 = vmatprep.mubr.msk.f32.mxu0 %vm4720_vm1, %v4718_v29 }
 0x589   : > { %v1326_v58 = vpop.f32.mrb[0].mxu0 }
 0x58a   : > { %v3650_v59 = vpop.f32.mrb[1].mxu0  ;;  %v1330_v60 = vsel %vm1254_vm2, %v1326_v58, -inf }
 0x58b   : > { %1331 = vmax.xlane.f32.xlu1 %v1330_v60 }
 0x58d   : > { %v1491_v61 = vpop.f32.mrb[2].mxu0 }
 0x58e   : > { %v3660_v62 = vpop.f32.mrb[3].mxu0  ;;  %v1495_v63 = vsel %vm1254_vm2, %v1491_v61, -inf }
 0x58f   : > { %1496 = vmax.xlane.f32.xlu0 %v1495_v63 }
 0x596   : > { %v1656_v1 = vpop.f32.mrb[4].mxu0 }
 0x597   : > { %v3670_v2 = vpop.f32.mrb[5].mxu0  ;;  %v1660_v3 = vsel %vm1254_vm2, %v1656_v1, -inf }
 0x598   : > { %1661 = vmax.xlane.f32.xlu1 %v1660_v3 }
 0x59a   : > { %v1821_v4 = vpop.f32.mrb[6].mxu0 }
 0x59b   : > { %v3680_v5 = vpop.f32.mrb[7].mxu0  ;;  %v1825_v6 = vsel %vm1254_vm2, %v1821_v4, -inf }
 0x59c   : > { %1826 = vmax.xlane.f32.xlu0 %v1825_v6 }
 0x5a9   : > { %1341 = vrot.lane.b32.xlu1 %v5438_v48, %s5812_s1  ;;  %s4733_s1 = smov 16  }
 0x618   : > { %v1332_v7 = vpop.xlane.xlu1 %1331 }
 0x619   : > { %v1333_v8 = vsub.f32 %v1326_v58, %v1332_v7  ;;  %v5522_v58 = vld [vmem:[%s5897_s6] sm:$0x3]  ;;  %s5902_s6 = sld [smem:[#allocation65_spill]] }
 0x61a   : > { %v1054_v59 = vrot.slane %v5522_v58, %v5517_v57 }
 0x61b   : > { %v1334_v9 = vmul.f32 1.442695, %v1333_v8 }
 0x61c   : > { %v1497_v10 = vpop.xlane.xlu0 %1496  ;;  %v1132_v62 = vadd.f32 %v5434_v44, %v1054_v59  ;;  %v3536_v59 = vld [vmem:[#allocation22] ss:$0 sm:$0xff] }
 0x61d   : > { %4081 = vpow2.f32 %v1334_v9  ;;  %v1498_v11 = vsub.f32 %v1491_v61, %v1497_v10 }
 0x61e   : > { %v5531_v2 = vrot.slane %v1132_v62, %v5517_v57  ;;  %v2013_v10 = vadd.f32 1.0, %v1132_v62 }
 0x61f   : > { %v1499_v12 = vmul.f32 1.442695, %v1498_v11  ;;  %v3532_v11 = vld [vmem:[#allocation19] ss:$0 sm:$0xff] }
 0x621   : > { %4083 = vpow2.f32 %v1499_v12 }
 0x625   : > { %v1662_v13 = vpop.xlane.xlu1 %1661 }
 0x626   : > { %v1663_v14 = vsub.f32 %v1656_v1, %v1662_v13 }
 0x627   : > { %v4082_v15 = vpop.eup %4081 }
 0x628   : > { %v1664_v16 = vmul.f32 1.442695, %v1663_v14  ;;  %v1336_v17 = vsel %vm1254_vm2, %v4082_v15, 0.0  ;;  %v5543_v14 = vrot.slane %v2013_v10, %v5517_v57 }
 0x629   : > { %1337 = vadd.xlane.f32.xlu1 %v1336_v17  ;;  %v1342_v18 = vpop.permute.xlu1 %1341  ;;  %v1827_v19 = vpop.xlane.xlu0 %1826 }
 0x62a   : > { %4085 = vpow2.f32 %v1664_v16  ;;  %v1828_v20 = vsub.f32 %v1821_v4, %v1827_v19  ;;  %3652 = vmatpush3.msra.mxu1 %v1342_v18 }
 0x62b   : > { %v4084_v21 = vpop.eup %4083  ;;  %3661 = vmatprep.subr.mxu1 %v4718_v29 }
 0x62c   : > { %v1829_v22 = vmul.f32 1.442695, %v1828_v20  ;;  %v1501_v23 = vsel %vm1254_vm2, %v4084_v21, 0.0 }
 0x62d   : > { %1502 = vadd.xlane.f32.xlu0 %v1501_v23 }
 0x62e   : > { %4087 = vpow2.f32 %v1829_v22 }
 0x634   : > { %v4086_v24 = vpop.eup %4085 }
 0x635   : > { %v1666_v25 = vsel %vm1254_vm2, %v4086_v24, 0.0 }
 0x636   : > { %1667 = vadd.xlane.f32.xlu1 %v1666_v25 }
 0x638   : > { %v4088_v26 = vpop.eup %4087 }
 0x639   : > { %v1831_v27 = vsel %vm1254_vm2, %v4088_v26, 0.0 }
 0x63a   : > { %1832 = vadd.xlane.f32.xlu0 %v1831_v27  ;;  %v2143_v27 = vld [vmem:[#allocation23 + $0x8] sm:$0xff] }
 0x647   : > { %1671 = vrot.lane.b32.xlu1 %v5438_v48, %s4729_s25  ;;  %s4734_s25 = smov 24  }
 0x64b   : > { %1836 = vrot.lane.b32.xlu1 %v5438_v48, %s4730_s3 }
 0x650   : > { %1506 = vrot.lane.b32.xlu0 %v5438_v48, %s4731_s7  ;;  %v1929_v48 = vld [vmem:[%s5896_s24] sm:$0xff]  ;;  %s5901_s7 = sld [smem:[#allocation63_spill]] }
 0x651   : > { %v3815_v50 = vpack.c.bf16 %v1930_v49, %v1929_v48  ;;  %v3535_v48 = vld [vmem:[#allocation13] ss:$0 sm:$0xff] }
 0x653   : > { %3816 = vmatpush3.bf16.msra.mxu0 %v3815_v50 }
 0x654   : > { %3817 = vmatprep.subr.bf16.mxu0 %v4719_v31 }
 0x657   : > { %3819 = vmatpush3.bf16.msra.mxu0 %v3818_v56 }
 0x658   : > { %3826 = vmatprep.subr.bf16.mxu0 %v4719_v31 }
 0x6b6   : > { %v1338_v28 = vpop.xlane.xlu1 %1337 }
 0x6b7   : > { %4089 = vrcp.f32 %v1338_v28 }
 0x6ba   : > { %v1503_v30 = vpop.xlane.xlu0 %1502 }
 0x6bb   : > { %4091 = vrcp.f32 %v1503_v30  ;;  %v2145_v30 = vld [vmem:[#allocation23 + $0x18] sm:$0xff] }
 0x6c1   : > { %v4090_v32 = vpop.eup %4089 }
 0x6c2   : > { %v1340_v33 = vmul.f32 %v4090_v32, %v4082_v15 }
 0x6c3   : > { %v1668_v34 = vpop.xlane.xlu1 %1667 }
 0x6c4   : > { %4093 = vrcp.f32 %v1668_v34  ;;  %3654 = vmatmul.mubr.msk.f32.vlgmr.msra.gmra.mrb[4].mxu1 %vm1254_vm2, %v1340_v33  ;;  %v1032_v33 = vld [vmem:[%s891_s23] sm:$0xff] }
 0x6c5   : > { %3663 = vmatprep.mubr.msk.f32.mxu1 %vm4720_vm1, %v4718_v29  ;;  %v4092_v36 = vpop.eup %4091  ;;  %v2058_v34 = vld [vmem:[#allocation20] sm:$0xff] }
 0x6c6   : > { %v1505_v37 = vmul.f32 %v4092_v36, %v4084_v21 }
 0x6c7   : > { %v1833_v35 = vpop.xlane.xlu0 %1832  ;;  %v1672_v38 = vpop.permute.xlu1 %1671 }
 0x6c8   : > { %4095 = vrcp.f32 %v1833_v35  ;;  %v2059_v35 = vld [vmem:[#allocation20 + $0x8] sm:$0xff] }
 0x6c9   : > { %v3821_v36 = vpack.c.bf16 %v2059_v35, %v2058_v34 }
 0x6cb   : > { %v1507_v39 = vpop.permute.xlu0 %1506  ;;  %v1837_v42 = vpop.permute.xlu1 %1836 }
 0x6cc   : > { %3662 = vmatpush3.msra.mxu1 %v1507_v39 }
 0x6cd   : > { %3664 = vmatmul.mubr.msk.f32.vlgmr.msra.gmra.mrb[6].mxu1 %vm1254_vm2, %v1505_v37  ;;  %3671 = vmatprep.subr.mxu1 %v4718_v29  ;;  %v2060_v37 = vld [vmem:[#allocation20 + $0x10] sm:$0xff] }
 0x6ce   : > { %v4094_v40 = vpop.eup %4093  ;;  %3672 = vmatpush3.msra.mxu1 %v1672_v38  ;;  %3673 = vmatprep.mubr.msk.f32.mxu1 %vm4720_vm1, %v4718_v29  ;;  %v2061_v38 = vld [vmem:[#allocation20 + $0x18] sm:$0xff] }
 0x6cf   : > { %v1670_v41 = vmul.f32 %v4094_v40, %v4086_v24  ;;  %3681 = vmatprep.subr.mxu1 %v4718_v29  ;;  %v3824_v39 = vpack.c.bf16 %v2061_v38, %v2060_v37 }
 0x6d1   : > { %3674 = vmatmul.mubr.msk.f32.vlgmr.msra.gmra.mrb[8].mxu1 %vm1254_vm2, %v1670_v41 }
 0x6d2   : > { %v4096_v43 = vpop.eup %4095  ;;  %3682 = vmatpush3.msra.mxu1 %v1837_v42  ;;  %3683 = vmatprep.mubr.msk.f32.mxu1 %vm4720_vm1, %v4718_v29 }
 0x6d3   : > { %v1835_v46 = vmul.f32 %v4096_v43, %v4088_v26  ;;  %3820 = vmatprep.subr.bf16.mxu1 %v4719_v31  ;;  %v2142_v26 = vld [vmem:[#allocation23] sm:$0xff] }
 0x6d4   : > { %v3827_v28 = vpack.c.bf16 %v2143_v27, %v2142_v26 }
 0x6d5   : > { %3684 = vmatmul.mubr.msk.f32.vlgmr.msra.gmra.mrb[10].mxu1 %vm1254_vm2, %v1835_v46  ;;  %v3534_v46 = vld [vmem:[#allocation11] ss:$0 sm:$0xff] }
 0x6d6   : > { %3705 = vmatprep.mubr.msk.f32.mxu1 %vm4720_vm1, %v4718_v29  ;;  %3822 = vmatpush3.bf16.msra.mxu1 %v3821_v36 }
 0x6d7   : > { %3823 = vmatprep.subr.bf16.mxu1 %v4719_v31 }
 0x6da   : > { %3825 = vmatpush3.bf16.msra.mxu1 %v3824_v39 }
 0x6db   : > { %3719 = vmatprep.subr.mxu1 %v4718_v29 }
 0x797   : > { %v1413_v52 = vpop.f32.mrb[4].mxu1 }
 0x798   : > { %v3655_v53 = vpop.f32.mrb[5].mxu1 }
 0x7a0   : > { %v1578_v60 = vpop.f32.mrb[6].mxu1 }
 0x7a1   : > { %1913 = vrot.lane.b32.xlu0 %v1578_v60, %s4732_s18  ;;  %v3665_v61 = vpop.f32.mrb[7].mxu1 }
 0x7a4   : > { %v1743_v63 = vpop.f32.mrb[8].mxu1 }
 0x7a5   : > { %1917 = vrot.lane.b32.xlu1 %v1743_v63, %s4733_s1  ;;  %v3675_v1 = vpop.f32.mrb[9].mxu1 }
 0x7a8   : > { %v1908_v3 = vpop.f32.mrb[10].mxu1 }
 0x7a9   : > { %2025 = vrot.lane.b32.xlu1 %v5531_v2, %s4721_s5  ;;  %1921 = vrot.lane.b32.xlu0 %v1908_v3, %s4734_s25  ;;  %v3685_v4 = vpop.f32.mrb[11].mxu1 }
 0x813   : > { %v1914_v5 = vpop.permute.xlu0 %1913 }
 0x814   : > { %v1924_v44 = vsel %vm1254_vm2, %v1413_v52, %v1914_v5  ;;  %v3538_v52 = vld [vmem:[#allocation25] ss:$0 sm:$0xff] }
 0x817   : > { %v1918_v6 = vpop.permute.xlu1 %1917 }
 0x818   : > { %v1926_v7 = vsel %vm1925_vm3, %v1924_v44, %v1918_v6 }
 0x81b   : > { %v1922_v8 = vpop.permute.xlu0 %1921  ;;  %v2026_v18 = vpop.permute.xlu1 %2025 }
 0x81c   : > { %v1928_v9 = vsel %vm1927_vm4, %v1926_v7, %v1922_v8 }
 0x81d   : > { %3695 = vmatmul.mubr.msk.f32.vlgmr.msra.gmra.mrb[8].mxu0 %vm1061_vm0, %v1928_v9 }
 0x81e   : > { %3716 = vmatprep.mubr.msk.f32.mxu0 %vm4720_vm1, %v4718_v29  ;;  %3828 = vmatpush3.bf16.msra.mxu0 %v3827_v28 }
 0x81f   : > { %3829 = vmatprep.subr.bf16.mxu0 %v4719_v31 }
 0x8f0   : > { %v2009_v12 = vpop.f32.mrb[8].mxu0 }
 0x8f1   : > { %v2010_v13 = vadd.f32 %v3532_v11, %v2009_v12  ;;  %v3696_v15 = vpop.f32.mrb[9].mxu0 }
 0x8f3   : > { %v2018_v16 = vmul.f32 %v5543_v14, %v2010_v13 }
 0x8f5   : > { %v2019_v17 = vadd.f32 %v2018_v16, %v5379_v0  ;;  %v2144_v0 = vld [vmem:[#allocation23 + $0x10] sm:$0xff] }
 0x8f6   : > { %v3830_v32 = vpack.c.bf16 %v2145_v30, %v2144_v0 }
 0x8f7   : > { %v5547_v19 = vadd.f32 %v2026_v18, %v2019_v17 }
 0x8f8   : > { %3831 = vmatpush3.bf16.msra.mxu0 %v3830_v32 }
 0x8f9   : > { %v2031_v20 = vsel %vm1061_vm0, %v5547_v19, 0.0  ;;  %3729 = vmatprep.subr.mxu0 %v4718_v29 }
 0x8fa   : > { %2032 = vadd.xlane.f32.xlu0 %v2031_v20 }
 0x8fb   : > { %3717 = vmatmul.mubr.msk.f32.vlgmr.msra.gmra.mrb[10].mxu0 %vm1061_vm0, %v1032_v33 }
 0x8fc   : > { %3731 = vmatprep.mubr.msk.f32.mxu0 %vm4720_vm1, %v4718_v29 }
 0x987   : > { %v2033_v21 = vpop.xlane.xlu0 %2032 }
 0x988   : > { %v2034_v22 = vmul.f32 0.03125, %v2033_v21 }
 0x98a   : > { %v2035_v23 = vsub.f32 %v5547_v19, %v2034_v22 }
 0x98c   : > { %v2036_v24 = vmul.f32 %v2035_v23, %v2035_v23 }
 0x98e   : > { %v2037_v25 = vsel %vm1061_vm0, %v2036_v24, 0.0 }
 0x98f   : > { %2038 = vadd.xlane.f32.xlu1 %v2037_v25 }
 0x9ce   : > { %v2222_v53 = vpop.f32.mrb[10].mxu0 }
 0x9cf   : > { %v5565_v54 = vadd.f32 %v3538_v52, %v2222_v53  ;;  %v3718_v55 = vpop.f32.mrb[11].mxu0 }
 0x9d1   : > { %2392 = vrot.lane.b32.xlu0 %v5565_v54, %s4722_s29 }
 0x9d5   : > { %2557 = vrot.lane.b32.xlu0 %v5565_v54, %s4726_s9 }
 0x9d9   : > { %2722 = vrot.lane.b32.xlu0 %v5565_v54, %s4727_s13 }
 0xa1c   : > { %v2039_v40 = vpop.xlane.xlu1 %2038 }
 0xa1d   : > { %v2040_v41 = vmul.f32 0.03125, %v2039_v40 }
 0xa1f   : > { %v2041_v42 = vadd.f32 1e-05, %v2040_v41 }
 0xa21   : > { %4097 = vrsqrt.f32 %v2041_v42 }
 0xa2b   : > { %v4098_v43 = vpop.eup %4097 }
 0xa2c   : > { %v2043_v47 = vmul.f32 %v4098_v43, %v2035_v23 }
 0xa2e   : > { %v2050_v49 = vmul.f32 %v3534_v46, %v2043_v47 }
 0xa30   : > { %v2057_v50 = vadd.f32 %v3535_v48, %v2050_v49 }
 0xa32   : > { %3706 = vmatmul.mubr.msk.f32.vlgmr.msra.gmra.mrb[12].mxu1 %vm1061_vm0, %v2057_v50 }
 0xa33   : > { %3721 = vmatprep.mubr.msk.f32.mxu1 %vm4720_vm1, %v4718_v29  ;;  %3720 = vmatpush3.xpose.msk.msra.mxu1 %vm1254_vm2, %v5565_v54 }
 0xa34   : > { %3724 = vmatprep.subr.mxu1 %v4718_v29 }
 0xa43   : > { %v2393_v56 = vpop.permute.xlu0 %2392 }
 0xa44   : > { %3730 = vmatpush3.xpose.msk.msra.mxu0 %vm1254_vm2, %v2393_v56 }
 0xa45   : > { %3739 = vmatprep.subr.mxu0 %v4718_v29 }
 0xa47   : > { %v2558_v1 = vpop.permute.xlu0 %2557 }
 0xa4b   : > { %v2723_v5 = vpop.permute.xlu0 %2722 }
 0xb05   : > { %v2138_v60 = vpop.f32.mrb[12].mxu1 }
 0xb06   : > { %v2139_v61 = vadd.f32 %v3536_v59, %v2138_v60  ;;  %v3707_v62 = vpop.f32.mrb[13].mxu1 }
 0xb08   : > { %v2226_v63 = vmul.f32 0.35355338, %v2139_v61 }
 0xb0a   : > { %2390 = vrot.lane.b32.xlu1 %v2226_v63, %s4722_s29  ;;  %3722 = vmatmul.mubr.msk.f32.vlgmr.msra.gmra.mrb[14].mxu1 %vm1254_vm2, %v2226_v63 }
 0xb0b   : > { %3726 = vmatprep.mubr.msk.f32.mxu1 %vm4720_vm1, %v4718_v29 }
 0xb0e   : > { %2555 = vrot.lane.b32.xlu1 %v2226_v63, %s4726_s9 }
 0xb12   : > { %2720 = vrot.lane.b32.xlu1 %v2226_v63, %s4727_s13  ;;  %s5900_s13 = sld [smem:[#allocation64_spill]] }
 0xb7c   : > { %v2391_v3 = vpop.permute.xlu1 %2390 }
 0xb7d   : > { %3732 = vmatmul.mubr.msk.f32.vlgmr.msra.gmra.mrb[12].mxu0 %vm1254_vm2, %v2391_v3  ;;  %v2901_v3 = vld [vmem:[#allocation26 + $0x8] sm:$0xff] }
 0xb7e   : > { %3740 = vmatpush3.xpose.msk.msra.mxu0 %vm1254_vm2, %v2558_v1  ;;  %3741 = vmatprep.mubr.msk.f32.mxu0 %vm4720_vm1, %v4718_v29  ;;  %v2900_v1 = vld [vmem:[#allocation26] sm:$0xff] }
 0xb7f   : > { %3749 = vmatprep.subr.mxu0 %v4718_v29 }
 0xb80   : > { %v2556_v4 = vpop.permute.xlu1 %2555 }
 0xb81   : > { %3742 = vmatmul.mubr.msk.f32.vlgmr.msra.gmra.mrb[14].mxu0 %vm1254_vm2, %v2556_v4  ;;  %v3833_v4 = vpack.c.bf16 %v2901_v3, %v2900_v1  ;;  %v3118_v1 = vld [vmem:[%s5900_s13 + $0x30] sm:$0xff] }
 0xb82   : > { %3750 = vmatpush3.xpose.msk.msra.mxu0 %vm1254_vm2, %v2723_v5  ;;  %3751 = vmatprep.mubr.msk.f32.mxu0 %vm4720_vm1, %v4718_v29  ;;  %v2902_v5 = vld [vmem:[#allocation26 + $0x10] sm:$0xff] }
 0xb83   : > { %3832 = vmatprep.subr.bf16.mxu0 %v4719_v31 }
 0xb84   : > { %v2721_v6 = vpop.permute.xlu1 %2720 }
 0xb85   : > { %3752 = vmatmul.mubr.msk.f32.vlgmr.msra.gmra.mrb[16].mxu0 %vm1254_vm2, %v2721_v6  ;;  %v2903_v6 = vld [vmem:[#allocation26 + $0x18] sm:$0xff] }
 0xb86   : > { %3767 = vmatprep.mubr.msk.f32.mxu0 %vm4720_vm1, %v4718_v29  ;;  %3834 = vmatpush3.bf16.msra.mxu0 %v3833_v4  ;;  %v3556_v4 = vld [vmem:[%s5901_s7] ss:$0 sm:$0xff] }
 0xb87   : > { %3835 = vmatprep.subr.bf16.mxu0 %v4719_v31 }
 0xbdd   : > { %v2299_v44 = vpop.f32.mrb[14].mxu1 }
 0xbde   : > { %v3723_v7 = vpop.f32.mrb[15].mxu1  ;;  %v2303_v8 = vsel %vm1254_vm2, %v2299_v44, -inf }
 0xbdf   : > { %2304 = vmax.xlane.f32.xlu0 %v2303_v8 }
 0xc50   : > { %v2464_v9 = vpop.f32.mrb[12].mxu0 }
 0xc51   : > { %v3733_v10 = vpop.f32.mrb[13].mxu0  ;;  %v2468_v11 = vsel %vm1254_vm2, %v2464_v9, -inf }
 0xc52   : > { %2469 = vmax.xlane.f32.xlu1 %v2468_v11 }
 0xc54   : > { %v2629_v12 = vpop.f32.mrb[14].mxu0 }
 0xc55   : > { %v3743_v13 = vpop.f32.mrb[15].mxu0  ;;  %v2633_v15 = vsel %vm1254_vm2, %v2629_v12, -inf }
 0xc56   : > { %2634 = vmax.xlane.f32.xlu0 %v2633_v15 }
 0xc58   : > { %v2794_v16 = vpop.f32.mrb[16].mxu0 }
 0xc59   : > { %v3753_v17 = vpop.f32.mrb[17].mxu0  ;;  %v2798_v18 = vsel %vm1254_vm2, %v2794_v16, -inf }
 0xc5a   : > { %2799 = vmax.xlane.f32.xlu0 %v2798_v18 }
 0xc63   : > { %2314 = vrot.lane.b32.xlu1 %v5565_v54, %s4721_s5 }
 0xc6c   : > { %v2305_v20 = vpop.xlane.xlu0 %2304 }
 0xc6d   : > { %v2306_v21 = vsub.f32 %v2299_v44, %v2305_v20  ;;  %v3836_v44 = vpack.c.bf16 %v2903_v6, %v2902_v5 }
 0xc6f   : > { %v2307_v22 = vmul.f32 1.442695, %v2306_v21  ;;  %3837 = vmatpush3.bf16.msra.mxu0 %v3836_v44 }
 0xc70   : > { %3844 = vmatprep.subr.bf16.mxu0 %v4719_v31 }
 0xc71   : > { %4099 = vpow2.f32 %v2307_v22 }
 0xc7b   : > { %v4100_v23 = vpop.eup %4099 }
 0xc7c   : > { %v2309_v24 = vsel %vm1254_vm2, %v4100_v23, 0.0 }
 0xc87   : > { %2310 = vadd.xlane.f32.xlu1 %v2309_v24 }
 0xcdf   : > { %v2470_v25 = vpop.xlane.xlu1 %2469 }
 0xce0   : > { %v2471_v26 = vsub.f32 %v2464_v9, %v2470_v25 }
 0xce2   : > { %v2472_v27 = vmul.f32 1.442695, %v2471_v26 }
 0xce3   : > { %v2315_v28 = vpop.permute.xlu1 %2314  ;;  %v2635_v0 = vpop.xlane.xlu0 %2634 }
 0xce4   : > { %4101 = vpow2.f32 %v2472_v27  ;;  %v2636_v30 = vsub.f32 %v2629_v12, %v2635_v0  ;;  %3725 = vmatpush3.msra.mxu1 %v2315_v28 }
 0xce5   : > { %3734 = vmatprep.subr.mxu1 %v4718_v29 }
 0xce6   : > { %v2637_v32 = vmul.f32 1.442695, %v2636_v30 }
 0xce7   : > { %v2800_v33 = vpop.xlane.xlu0 %2799 }
 0xce8   : > { %4103 = vpow2.f32 %v2637_v32  ;;  %v2801_v34 = vsub.f32 %v2794_v16, %v2800_v33  ;;  %v1057_v32 = vsub.s32 1, %v5507_v51  ;;  %v3029_v51 = vld [vmem:[#allocation28 + $0x10] sm:$0xff] }
 0xcea   : > { %v2802_v35 = vmul.f32 1.442695, %v2801_v34  ;;  %v1058_v33 = vrot.slane %v5522_v58, %v1057_v32 }
 0xcec   : > { %4105 = vpow2.f32 %v2802_v35 }
 0xcee   : > { %v4102_v36 = vpop.eup %4101 }
 0xcef   : > { %v2474_v37 = vsel %vm1254_vm2, %v4102_v36, 0.0 }
 0xcf0   : > { %2475 = vadd.xlane.f32.xlu0 %v2474_v37 }
 0xcf2   : > { %v4104_v38 = vpop.eup %4103 }
 0xcf3   : > { %v2639_v39 = vsel %vm1254_vm2, %v4104_v38, 0.0 }
 0xcf4   : > { %2640 = vadd.xlane.f32.xlu1 %v2639_v39  ;;  %v3028_v39 = vld [vmem:[#allocation28 + $0x8] sm:$0xff] }
 0xcf6   : > { %v4106_v40 = vpop.eup %4105 }
 0xcf7   : > { %v2804_v41 = vsel %vm1254_vm2, %v4106_v40, 0.0 }
 0xcf8   : > { %2805 = vadd.xlane.f32.xlu0 %v2804_v41  ;;  %v3112_v41 = vld [vmem:[%s5900_s13] sm:$0xff] }
 0xd05   : > { %2644 = vrot.lane.b32.xlu1 %v5565_v54, %s4724_s8  ;;  %s5899_s8 = smov 64  }
 0xd09   : > { %2809 = vrot.lane.b32.xlu1 %v5565_v54, %s4725_s17  ;;  %s4735_s17 = smov 32  }
 0xd0e   : > { %2479 = vrot.lane.b32.xlu0 %v5565_v54, %s4723_s0  ;;  %s5898_s0 = sld [smem:[#allocation62_spill]] }
 0xd14   : > { %v2311_v42 = vpop.xlane.xlu1 %2310  ;;  %v3552_v21 = vld [vmem:[%s5898_s0] ss:$0 sm:$0xff]  ;;  %s5903_s0 = sld [smem:[#allocation68_spill]] }
 0xd15   : > { %4107 = vrcp.f32 %v2311_v42  ;;  %v3113_v42 = vld [vmem:[%s5900_s13 + $0x8] sm:$0xff] }
 0xd1f   : > { %v4108_v43 = vpop.eup %4107 }
 0xd20   : > { %v2313_v46 = vmul.f32 %v4108_v43, %v4100_v23  ;;  %v3114_v43 = vld [vmem:[%s5900_s13 + $0x10] sm:$0xff] }
 0xd22   : > { %3727 = vmatmul.mubr.msk.f32.vlgmr.msra.gmra.mrb[16].mxu1 %vm1254_vm2, %v2313_v46  ;;  %v3845_v46 = vpack.c.bf16 %v3113_v42, %v3112_v41 }
 0xd23   : > { %3736 = vmatprep.mubr.msk.f32.mxu1 %vm4720_vm1, %v4718_v29 }
 0xd7d   : > { %v2476_v47 = vpop.xlane.xlu0 %2475 }
 0xd7e   : > { %4109 = vrcp.f32 %v2476_v47  ;;  %v3115_v47 = vld [vmem:[%s5900_s13 + $0x18] sm:$0xff] }
 0xd81   : > { %v2641_v48 = vpop.xlane.xlu1 %2640 }
 0xd82   : > { %4111 = vrcp.f32 %v2641_v48  ;;  %v3848_v48 = vpack.c.bf16 %v3115_v47, %v3114_v43 }
 0xd85   : > { %v2806_v49 = vpop.xlane.xlu0 %2805  ;;  %v2645_v53 = vpop.permute.xlu1 %2644 }
 0xd86   : > { %4113 = vrcp.f32 %v2806_v49  ;;  %v3116_v49 = vld [vmem:[%s5900_s13 + $0x20] sm:$0xff] }
 0xd88   : > { %v4110_v50 = vpop.eup %4109 }
 0xd89   : > { %v2478_v52 = vmul.f32 %v4110_v50, %v4102_v36  ;;  %v2480_v55 = vpop.permute.xlu0 %2479  ;;  %v2810_v59 = vpop.permute.xlu1 %2809  ;;  %v3117_v50 = vld [vmem:[%s5900_s13 + $0x28] sm:$0xff] }
 0xd8a   : > { %3735 = vmatpush3.msra.mxu1 %v2480_v55 }
 0xd8b   : > { %3737 = vmatmul.mubr.msk.f32.vlgmr.msra.gmra.mrb[18].mxu1 %vm1254_vm2, %v2478_v52  ;;  %3744 = vmatprep.subr.mxu1 %v4718_v29  ;;  %v3851_v52 = vpack.c.bf16 %v3117_v50, %v3116_v49 }
 0xd8c   : > { %v4112_v54 = vpop.eup %4111  ;;  %3745 = vmatpush3.msra.mxu1 %v2645_v53  ;;  %3746 = vmatprep.mubr.msk.f32.mxu1 %vm4720_vm1, %v4718_v29 }
 0xd8d   : > { %v2643_v56 = vmul.f32 %v4112_v54, %v4104_v38  ;;  %3754 = vmatprep.subr.mxu1 %v4718_v29  ;;  %v3027_v38 = vld [vmem:[#allocation28] sm:$0xff] }
 0xd8f   : > { %3747 = vmatmul.mubr.msk.f32.vlgmr.msra.gmra.mrb[20].mxu1 %vm1254_vm2, %v2643_v56 }
 0xd90   : > { %v4114_v60 = vpop.eup %4113  ;;  %3755 = vmatpush3.msra.mxu1 %v2810_v59  ;;  %3756 = vmatprep.mubr.msk.f32.mxu1 %vm4720_vm1, %v4718_v29  ;;  %v3554_v59 = vld [vmem:[#allocation14] ss:$0 sm:$0xff] }
 0xd91   : > { %v2808_v61 = vmul.f32 %v4114_v60, %v4106_v40  ;;  %3838 = vmatprep.subr.bf16.mxu1 %v4719_v31  ;;  %v3839_v40 = vpack.c.bf16 %v3028_v39, %v3027_v38 }
 0xd93   : > { %3757 = vmatmul.mubr.msk.f32.vlgmr.msra.gmra.mrb[22].mxu1 %vm1254_vm2, %v2808_v61  ;;  %v3555_v61 = vld [vmem:[#allocation16] ss:$0 sm:$0xff] }
 0xd94   : > { %3778 = vmatprep.mubr.msk.f32.mxu1 %vm4720_vm1, %v4718_v29  ;;  %3840 = vmatpush3.bf16.msra.mxu1 %v3839_v40 }
 0xd95   : > { %3841 = vmatprep.subr.bf16.mxu1 %v4719_v31 }
 0xdf5   : > { %v2386_v62 = vpop.f32.mrb[16].mxu1 }
 0xdf6   : > { %v3728_v63 = vpop.f32.mrb[17].mxu1 }
 0xe5e   : > { %v2551_v7 = vpop.f32.mrb[18].mxu1 }
 0xe5f   : > { %2886 = vrot.lane.b32.xlu0 %v2551_v7, %s4732_s18  ;;  %v3738_v8 = vpop.f32.mrb[19].mxu1  ;;  %s3561_s18 = sshll.u32 %s4888_s26, 7 }
 0xe62   : > { %v2716_v9 = vpop.f32.mrb[20].mxu1 }
 0xe63   : > { %2890 = vrot.lane.b32.xlu1 %v2716_v9, %s4733_s1  ;;  %v3748_v10 = vpop.f32.mrb[21].mxu1  ;;  %v3558_v9 = vld [vmem:[%s5902_s6] ss:$0 sm:$0xff]  ;;  %s1030_s1 = scalar_lea.vmem [#allocation29], %s5336_s14  ;;  %s4736_s14 = smov [#allocation29]  }
 0xe64   : > { %s4603_s9 = sshll.u32 %s4736_s14, 4  ;;  %s4604_s9 = int_to_ptr.vmem [resolvable:$false] %s4603_s9 }
 0xe66   : > { %v2881_v11 = vpop.f32.mrb[22].mxu1 }
 0xe67   : > { %2894 = vrot.lane.b32.xlu0 %v2881_v11, %s4734_s25  ;;  %v3758_v12 = vpop.f32.mrb[23].mxu1  ;;  %s3232_s25 = sshll.u32 %s1030_s1, 4  ;;  %s5703_s25 = int_to_ptr.vmem [resolvable:$true] %s3232_s25 }
 0xe68   : > { %s4599_s26 = scalar_lea.vmem %s5703_s25, 128  ;;  %p4606_p7 = scmp.lt.s32.totalorder %s5703_s25, %s4604_s9 }
 0xe69   : > { %p4600_p10 = scmp.ne.s32.totalorder %s5703_s25, %s4599_s26 }
 0xe6b   : > { %p4601_p3 = pnand %p4600_p10, %p5904_p13 }
 0xe6d   : > { %p4602_p5 = pneg %p4601_p3 }
 0xed1   : > { %v2887_v13 = vpop.permute.xlu0 %2886 }
 0xed2   : > { %v2897_v16 = vsel %vm1254_vm2, %v2386_v62, %v2887_v13 }
 0xed5   : > { %v2891_v15 = vpop.permute.xlu1 %2890 }
 0xed6   : > { %v2898_v17 = vsel %vm1925_vm3, %v2897_v16, %v2891_v15 }
 0xed9   : > { %v2895_v18 = vpop.permute.xlu0 %2894 }
 0xeda   : > { %v2899_v20 = vsel %vm1927_vm4, %v2898_v17, %v2895_v18 }
 0xedb   : > { %3768 = vmatmul.mubr.msk.f32.vlgmr.msra.gmra.mrb[18].mxu0 %vm1061_vm0, %v2899_v20 }
 0xedc   : > { %3797 = vmatprep.mubr.msk.f32.mxu0 %vm4720_vm1, %v4718_v29  ;;  %3846 = vmatpush3.bf16.msra.mxu0 %v3845_v46 }
 0xedd   : > { %3847 = vmatprep.subr.bf16.mxu0 %v4719_v31 }
 0xee0   : > { %3849 = vmatpush3.bf16.msra.mxu0 %v3848_v48 }
 0xee1   : > { %3850 = vmatprep.subr.bf16.mxu0 %v4719_v31 }
 0xee4   : > { %3852 = vmatpush3.bf16.msra.mxu0 %v3851_v52 }
 0xee5   : > { %3853 = vmatprep.subr.bf16.mxu0 %v4719_v31  ;;  %v3119_v31 = vld [vmem:[%s5900_s13 + $0x38] sm:$0xff] }
 0xee6   : > { %v3854_v3 = vpack.c.bf16 %v3119_v31, %v3118_v1 }
 0xee8   : > { %3855 = vmatpush3.bf16.msra.mxu0 %v3854_v3 }
 0xfae   : > { %v2980_v22 = vpop.f32.mrb[18].mxu0 }
 0xfaf   : > { %v2981_v23 = vadd.f32 %v3552_v21, %v2980_v22  ;;  %v3769_v24 = vpop.f32.mrb[19].mxu0 }
 0xfb1   : > { %2985 = vrot.lane.b32.xlu1 %v2981_v23, %s5899_s8 }
 0xfb5   : > { %2994 = vrot.lane.b32.xlu1 %v5531_v2, %s4735_s17  ;;  %v1134_v2 = vadd.f32 %v5436_v45, %v1058_v33  ;;  %v3030_v45 = vld [vmem:[#allocation28 + $0x18] sm:$0xff]  ;;  %s3219_s17 = scalar_lea.sflag [#allocation4], %s5333_s12 }
 0xfb6   : > { %v3842_v58 = vpack.c.bf16 %v3030_v45, %v3029_v51 }
 0xfb7   : > { %v3201_v8 = vadd.f32 1.0, %v1134_v2 }
 0xfb8   : > { %3843 = vmatpush3.bf16.msra.mxu1 %v3842_v58 }
 0xfb9   : > { %v3205_v12 = vrot.slane %v3201_v8, %v5517_v57 }
0x1023   : > { %v2986_v25 = vpop.permute.xlu1 %2985 }
0x1024   : > { %v2988_v26 = vmul.f32 %v2986_v25, %v5543_v14  ;;  %v3211_v14 = vrot.slane %v1134_v2, %v5517_v57 }
0x1026   : > { %2990 = vrot.lane.b32.xlu0 %v2988_v26, %s5899_s8  ;;  %s5701_s8 = scalar_lea.hbm %s5903_s0, %s3561_s18 }
0x1027   : > { %v2995_v28 = vpop.permute.xlu1 %2994 }
0x1098   : > { %v2991_v27 = vpop.permute.xlu0 %2990 }
0x1099   : > { %v2993_v29 = vadd.f32 %v2991_v27, %v5547_v19 }
0x109b   : > { %v5648_v0 = vadd.f32 %v2995_v28, %v2993_v29 }
0x109d   : > { %v3000_v30 = vsel %vm1061_vm0, %v5648_v0, 0.0 }
0x109e   : > { %3001 = vadd.xlane.f32.xlu0 %v3000_v30 }
0x10b4   : > { %3213 = vrot.lane.b32.xlu0 %v3211_v14, %s4721_s5  ;;  %s4605_s5 = scalar_lea.vmem %s4604_s9, 256 }
0x10b5   : > { %p4607_p8 = scmp.lt.s32.totalorder %s4605_s5, %s4599_s26 }
0x10b7   : > { %p4608_p9 = por %p4607_p8, %p4606_p7 }
0x10b9   : > { %p4609_p4 = pnand %p4608_p9, %p4602_p5 }
0x112b   : > { %v3002_v34 = vpop.xlane.xlu0 %3001 }
0x112c   : > { %v3003_v35 = vmul.f32 0.03125, %v3002_v34 }
0x112e   : > { %v3004_v19 = vsub.f32 %v5648_v0, %v3003_v35 }
0x112f   : > { %v3214_v17 = vpop.permute.xlu0 %3213 }
0x1130   : > { %v3005_v36 = vmul.f32 %v3004_v19, %v3004_v19 }
0x1132   : > { %v3006_v37 = vsel %vm1061_vm0, %v3005_v36, 0.0 }
0x1133   : > { %3007 = vadd.xlane.f32.xlu1 %v3006_v37 }
0x11c0   : > { %v3008_v53 = vpop.xlane.xlu1 %3007 }
0x11c1   : > { %v3009_v55 = vmul.f32 0.03125, %v3008_v53 }
0x11c3   : > { %v3010_v54 = vadd.f32 1e-05, %v3009_v55 }
0x11c5   : > { %4115 = vrsqrt.f32 %v3010_v54 }
0x11cf   : > { %v4116_v56 = vpop.eup %4115 }
0x11d0   : > { %v3012_v60 = vmul.f32 %v4116_v56, %v3004_v19 }
0x11d2   : > { %v3019_v62 = vmul.f32 %v3554_v59, %v3012_v60 }
0x11d4   : > { %v3026_v63 = vadd.f32 %v3555_v61, %v3019_v62 }
0x11d6   : > { %3779 = vmatmul.mubr.msk.f32.vlgmr.msra.gmra.mrb[24].mxu1 %vm1061_vm0, %v3026_v63 }
0x12a9   : > { %v3107_v5 = vpop.f32.mrb[24].mxu1 }
0x12aa   : > { %v3108_v6 = vadd.f32 %v3556_v4, %v3107_v5  ;;  %v3780_v44 = vpop.f32.mrb[25].mxu1 }
0x12ac   : > { %v3111_v7 = vmax.f32 %v3108_v6, 0.0 }
0x12ae   : > { %3798 = vmatmul.mubr.msk.f32.vlgmr.msra.gmra.mrb[20].mxu0 %vm3127_vm5, %v3111_v7 }
0x1381   : > { %v3197_v10 = vpop.f32.mrb[20].mxu0 }
0x1382   : > { %v3198_v11 = vadd.f32 %v3558_v9, %v3197_v10  ;;  %v3799_v13 = vpop.f32.mrb[21].mxu0 }
0x1384   : > { %v3206_v15 = vmul.f32 %v3205_v12, %v3198_v11 }
0x1386   : > { %v3207_v16 = vadd.f32 %v3206_v15, %v5648_v0 }
0x1388   : > { %v3216_v18 = vadd.f32 %v3214_v17, %v3207_v16 }
0x138a   : > { %3217 = vst.msk [vmem:[%s1030_s1] sm:$0xff] %vm1061_vm0, %v3216_v18 }
0x138b   : > { %4612 = shalt.err (!%p4609_p4)
}
0x138c   : > { %s4613_s12 = scalar_lea.hbm %s5701_s8, 128  ;;  %s4617_s4 = scalar_lea.hbm %s5903_s0, 256 }
0x138d   : > { %p4614_p6 = scmp.ne.s32.totalorder %s5701_s8, %s4613_s12  ;;  %p4618_p12 = scmp.lt.u32.totalorder %s5701_s8, %s5903_s0 }
0x138e   : > { %p4619_p2 = scmp.lt.u32.totalorder %s4617_s4, %s4613_s12  ;;  %p4621_p10 = scmp.lt.u32.totalorder %s4613_s12, %s5701_s8 }
0x138f   : > { %p4615_p0 = pnand %p4614_p6, %p5904_p13 }
0x1390   : > { %p4620_p1 = por %p4619_p2, %p4618_p12 }
0x1391   : > { %p4616_p11 = pneg %p4615_p0 }
0x1392   : > { %p4622_p3 = por %p4621_p10, %p4620_p1 }
0x1394   : > { %p4623_p5 = pnand %p4622_p3, %p4616_p11 }
0x1396   : > { %4626 = shalt.err (!%p4623_p5)
}
0x1397   : > { %3918 = dma.vmem_to_hbm [thread:$0]  (%p5904_p13), %s5703_s25, 128, %s5701_s8, %s3219_s17  }
0x1398 PF: > { %s5905_s18 = sld [smem:[#allocation40_spill]]  ;;  %s5906_s1 = sld [smem:[#allocation44_spill]] }
0x1399   : > { %p5908_p8 = scmp.ge.s32.totalorder %s4697_s30, 2 }
0x139e   : > { %s3244_s23 = sand.u32 1, %s5905_s18   ;;  %p5907_p7 = scmp.ne.s32.totalorder %s5906_s1, 0 }
0x139f   : > { %s3245_s29 = scalar_lea.sflag [#allocation4], %s3244_s23 }
0x13a0   : > { %p3974_p9 = pnand %p5908_p8, %p5907_p7 }
0x13a2   : > { %4680 = dma.done.wait (!%p3974_p9), %s3245_s29, 128  }
0x13a3   : > { %4682 = vsyncadd (!%p3974_p9), %s3245_s29, 4294967168  ;;  %s5909_s30 = sld [smem:[#allocation42_spill]]  ;;  %s5910_s26 = sld [smem:[#allocation41_spill]] }
0x13a4   : > { %s5911_s6 = sld [smem:[#allocation43_spill]]  ;;  %s5912_s29 = smov %s4689_s2 }
0x13a9   : > { %p48_p4 = scmp.ge.s32.totalorder %s5909_s30, 4   ;;  %s5913_s2 = smov %s5910_s26 }
0x13ab   :  { %50 = sbr.rel (!%p48_p4) target bundleno = 39 (0x27), region = 245 }
0x13b2   :  { %3250 = vsyncpa [#allocation3], 1 }
0x13b3   :  { %3252 = vsyncpa [#allocation3 + $0x1], 1 }
0x13b4   :  { %3253 = vsyncpa [#allocation6], 1 }
0x13b5   :  { %3255 = vsyncpa [#allocation6 + $0x1], 1 }
0x13b6   :  { %3256 = vsyncpa [#allocation9], 1 }
0x13b7   :  { %3257 = vsyncpa [#allocation12], 1 }
0x13b8   :  { %3258 = vsyncpa [#allocation15], 1 }
0x13b9   :  { %3259 = vsyncpa [#allocation18], 1 }
0x13ba   :  { %3260 = vsyncpa [#allocation21], 1 }
0x13bb   :  { %3261 = vsyncpa [#allocation24], 1 }
0x13bc   :  { %3262 = vsyncpa [#allocation27], 1 }
0x13bd   :  { %3263 = vsyncpa [#allocation4], 1 }
0x13be   :  { %3265 = vsyncpa [#allocation4 + $0x1], 1 }

</bundles_post_ra>
